<compile_context>
chip_gen: v7x
topology: tpu7x:2x2x1
jax: 0.10.0
libtpu: 0.0.40
codegen_flags: <defaults>
</compile_context>

<pallas_src>
import jax
import jax.numpy as jnp
import numpy as np
from jax.experimental import pallas as pl
from jax.experimental.pallas import tpu as pltpu


# ----------------------------------------------------------------------------
# Pallas kernel: full LSTM (all layers, all timesteps) + LayerNorm + pack output
# ----------------------------------------------------------------------------
def lstm_encoder_kernel(emb_ref, wih_ref, whh_ref, b_ref, lnw_ref, lnb_ref, out_ref):
    # emb_ref : (T*B, H) bf16   time-major embedded input; row t*B+b = (step t, batch b)
    # wih_ref : (L, H, 4H) bf16  input->gates weights (pre-transposed, i/f/o pre-scaled by 1/2)
    # whh_ref : (L, H, 4H) bf16  hidden->gates weights (pre-transposed, i/f/o pre-scaled by 1/2)
    # b_ref   : (L, 1, 4H) f32   combined bias (b_ih + b_hh, i/f/o pre-scaled by 1/2)
    # lnw_ref : (1, H) f32, lnb_ref : (1, H) f32   LayerNorm affine params
    # out_ref : (B, 2*L*H) f32
    TB, H = emb_ref.shape
    L = wih_ref.shape[0]
    fourH = wih_ref.shape[2]
    B = out_ref.shape[0]
    T = TB // B
    eps = 1e-5

    lnw = lnw_ref[...]
    lnb = lnb_ref[...]

    # Lane-wise constants for the fused gate activation:
    #   sigmoid(x) = 0.5*tanh(x/2) + 0.5 ; the /2 was folded into the pre-scaled
    #   weights/bias, so the i/f/o columns only need the 0.5*t + 0.5 epilogue while
    #   the g (cell-candidate) column keeps plain tanh.
    lane = jax.lax.broadcasted_iota(jnp.int32, (1, fourH), 1)
    is_g = (lane >= 2 * H) & (lane < 3 * H)
    post_scale = jnp.where(is_g, 1.0, 0.5).astype(jnp.float32)
    post_offset = jnp.where(is_g, 0.0, 0.5).astype(jnp.float32)

    seq = emb_ref[...]                 # (T*B, H): current layer's input sequence
    h_outs, c_outs = [], []

    for l in range(L):                 # static unroll over layers
        wih = wih_ref[l]               # (H, 4H) bf16
        whh = whh_ref[l]               # (H, 4H) bf16
        bias = b_ref[l]                # (1, 4H) f32

        # Hoisted input projection: one big matmul per layer, off the recurrence.
        xg = jnp.dot(seq.astype(jnp.bfloat16), wih,
                     preferred_element_type=jnp.float32) + bias      # (T*B, 4H) f32

        h = jnp.zeros((B, H), jnp.float32)
        c = jnp.zeros((B, H), jnp.float32)
        hs = []
        for t in range(T):             # fully unrolled (T static) -> static slices
            gates = xg[t * B:(t + 1) * B, :] + jnp.dot(
                h.astype(jnp.bfloat16), whh, preferred_element_type=jnp.float32)
            # One tanh over the whole 4H gate vector + fused scale/offset.
            act = jnp.tanh(gates) * post_scale + post_offset
            i_g = act[:, 0 * H:1 * H]
            f_g = act[:, 1 * H:2 * H]
            g_g = act[:, 2 * H:3 * H]
            o_g = act[:, 3 * H:4 * H]
            c = f_g * c + i_g * g_g
            h = o_g * jnp.tanh(c)
            if l < L - 1:
                hs.append(h)
        if l < L - 1:
            seq = jnp.concatenate(hs, axis=0)    # (T*B, H) next layer's input
        h_outs.append(h)
        c_outs.append(c)

    # Single LayerNorm pass over all 2L final states stacked on the sublane axis.
    stacked = jnp.concatenate(h_outs + c_outs, axis=0)               # (2L*B, H)
    mu = jnp.mean(stacked, axis=-1, keepdims=True)
    var = jnp.mean((stacked - mu) ** 2, axis=-1, keepdims=True)
    normed = (stacked - mu) * jax.lax.rsqrt(var + eps) * lnw + lnb

    # hidden = cat((h_n, c_n), 0).permute(1, 0, 2).flatten(1)
    # Single lane-dense store: [ln(h_0)..ln(h_{L-1}), ln(c_0)..ln(c_{L-1})] per row.
    out_ref[...] = jnp.concatenate(
        [normed[k * B:(k + 1) * B, :] for k in range(2 * L)], axis=-1)


# ----------------------------------------------------------------------------
# One-time parameter preprocessing (hoisted out of the per-call forward)
# ----------------------------------------------------------------------------
def prepare_encoder_params(params):
    L, fourH, H = params["w_ih"].shape
    # Pre-scale i/f/o gate columns by 1/2 (exact power-of-two, bf16-safe) so the
    # kernel can use the single-tanh sigmoid formulation.
    gate_scale = np.full((fourH,), 0.5, np.float32)
    gate_scale[2 * H:3 * H] = 1.0                     # g-gate (tanh) keeps full scale
    gate_scale = jnp.asarray(gate_scale)

    w_ih = params["w_ih"] * gate_scale[None, :, None]
    w_hh = params["w_hh"] * gate_scale[None, :, None]
    bias = (params["b_ih"] + params["b_hh"]) * gate_scale[None, :]
    return {
        "emb_table": params["emb_table"].astype(jnp.float32),
        "wih_t": jnp.transpose(w_ih, (0, 2, 1)).astype(jnp.bfloat16),   # (L,H,4H)
        "whh_t": jnp.transpose(w_hh, (0, 2, 1)).astype(jnp.bfloat16),   # (L,H,4H)
        "bias": bias[:, None, :].astype(jnp.float32),                    # (L,1,4H)
        "ln_w": params["ln_w"][None, :].astype(jnp.float32),             # (1,H)
        "ln_b": params["ln_b"][None, :].astype(jnp.float32),             # (1,H)
    }


# ----------------------------------------------------------------------------
# Wrapper (embedding gather + layout plumbing in plain JAX, LSTM in Pallas)
# ----------------------------------------------------------------------------
@jax.jit
def schedule_encoder_forward(x, prep):
    """x: (B, T, 2) where [..., 0] = activity index, [..., 1] = duration."""
    B, T, _ = x.shape
    L, H, fourH = prep["wih_t"].shape

    # CustomDurationEmbeddingConcat: embed act index to H-1 dims, concat duration.
    # TODO(synk): embedding/output dropout omitted (inference/eval semantics -> identity).
    acts = x[..., 0].astype(jnp.int32)
    dur = x[..., 1:2].astype(jnp.float32)
    embedded = jnp.take(prep["emb_table"], acts, axis=0)           # (B, T, H-1)
    embedded = jnp.concatenate([embedded, dur], axis=-1)           # (B, T, H)
    # Time-major, flattened to 2D so the per-layer input projection in the kernel
    # is a single (T*B, H) @ (H, 4H) matmul; cast to bf16 once here (matmul operand dtype).
    emb2d = jnp.transpose(embedded, (1, 0, 2)).reshape(T * B, H).astype(jnp.bfloat16)

    vmem = pl.BlockSpec(memory_space=pltpu.MemorySpace.VMEM)
    # TODO(synk): no grid -> single TensorCore; add a "parallel" grid over B for
    # v7x megacore once the batch grows beyond a few rows.
    return pl.pallas_call(
        lstm_encoder_kernel,
        out_shape=jax.ShapeDtypeStruct((B, 2 * L * H), jnp.float32),
        in_specs=[vmem] * 6,
        out_specs=vmem,
    )(emb2d, prep["wih_t"], prep["whh_t"], prep["bias"], prep["ln_w"], prep["ln_b"])


# ----------------------------------------------------------------------------
# Pure-JAX reference (same math: bf16 matmul operands, f32 accumulation)
# ----------------------------------------------------------------------------
def schedule_encoder_reference(x, params):
    emb_table = params["emb_table"]
    w_ih, w_hh = params["w_ih"], params["w_hh"]
    b_ih, b_hh = params["b_ih"], params["b_hh"]
    ln_w, ln_b = params["ln_w"], params["ln_b"]
    B, T, _ = x.shape
    L, fourH, H = w_ih.shape

    acts = x[..., 0].astype(jnp.int32)
    dur = x[..., 1:2].astype(jnp.float32)
    seq = jnp.transpose(
        jnp.concatenate([jnp.take(emb_table, acts, axis=0), dur], axis=-1), (1, 0, 2))

    def layer_norm(v):
        mu = jnp.mean(v, -1, keepdims=True)
        var = jnp.mean((v - mu) ** 2, -1, keepdims=True)
        return (v - mu) * jax.lax.rsqrt(var + 1e-5) * ln_w + ln_b

    hs, cs = [], []
    for l in range(L):
        wih = w_ih[l].astype(jnp.bfloat16).T   # (H, 4H)
        whh = w_hh[l].astype(jnp.bfloat16).T   # (H, 4H)
        b = (b_ih[l] + b_hh[l]).astype(jnp.float32)

        def step(carry, x_t, wih=wih, whh=whh, b=b):
            h, c = carry
            gates = (jnp.dot(x_t.astype(jnp.bfloat16), wih, preferred_element_type=jnp.float32)
                     + jnp.dot(h.astype(jnp.bfloat16), whh, preferred_element_type=jnp.float32)
                     + b)
            i_g = jax.nn.sigmoid(gates[:, 0:H])
            f_g = jax.nn.sigmoid(gates[:, H:2 * H])
            g_g = jnp.tanh(gates[:, 2 * H:3 * H])
            o_g = jax.nn.sigmoid(gates[:, 3 * H:4 * H])
            c = f_g * c + i_g * g_g
            h = o_g * jnp.tanh(c)
            return (h, c), h

        (h_n, c_n), ys = jax.lax.scan(
            step, (jnp.zeros((B, H), jnp.float32), jnp.zeros((B, H), jnp.float32)), seq)
        seq = ys
        hs.append(layer_norm(h_n))
        cs.append(layer_norm(c_n))

    # cat((h_n, c_n), 0).permute(1,0,2).flatten(1)
    return jnp.concatenate(hs + cs, axis=-1)


# ----------------------------------------------------------------------------
def init_params(key, vocab, H, L):
    ks = jax.random.split(key, 5)
    s = 1.0 / np.sqrt(H)
    return {
        "emb_table": jax.random.normal(ks[0], (vocab, H - 1), jnp.float32) * 0.3,
        "w_ih": jax.random.uniform(ks[1], (L, 4 * H, H), jnp.float32, -s, s),
        "w_hh": jax.random.uniform(ks[2], (L, 4 * H, H), jnp.float32, -s, s),
        "b_ih": jax.random.uniform(ks[3], (L, 4 * H), jnp.float32, -s, s),
        "b_hh": jax.random.uniform(ks[4], (L, 4 * H), jnp.float32, -s, s),
        "ln_w": jnp.ones((H,), jnp.float32),
        "ln_b": jnp.zeros((H,), jnp.float32),
    }


if __name__ == "__main__":
    B, T, H, L, vocab = 2, 8, 32, 2, 6  # batch, seq, hidden_size, num_layers, input_size

    key = jax.random.PRNGKey(0)
    kp, ka, kd = jax.random.split(key, 3)
    params = init_params(kp, vocab, H, L)
    prep = prepare_encoder_params(params)   # one-time preprocessing

    acts = jax.random.randint(ka, (B, T), 0, vocab).astype(jnp.float32)
    durs = jax.random.uniform(kd, (B, T), jnp.float32)
    x = jnp.stack([acts, durs], axis=-1)    # (B, T, 2)

    out = schedule_encoder_forward(x, prep)
    out = jax.block_until_ready(out)
    assert out.shape == (B, 2 * L * H), out.shape

    ref = jax.block_until_ready(schedule_encoder_reference(x, params))
    np.testing.assert_allclose(np.asarray(out), np.asarray(ref), atol=1e-3, rtol=1e-3)

    print("KERNEL_OK")
</pallas_src>

<mosaic_0001>
module attributes {stable_mosaic.version = 11 : i64} {
  func.func @lstm_encoder_kernel(%arg0: memref<16x32xbf16, #tpu.memory_space<vmem>>, %arg1: memref<2x32x128xbf16, #tpu.memory_space<vmem>>, %arg2: memref<2x32x128xbf16, #tpu.memory_space<vmem>>, %arg3: memref<2x1x128xf32, #tpu.memory_space<vmem>>, %arg4: memref<1x32xf32, #tpu.memory_space<vmem>>, %arg5: memref<1x32xf32, #tpu.memory_space<vmem>>, %arg6: memref<2x128xf32, #tpu.memory_space<vmem>>) attributes {dimension_semantics = [], scalar_prefetch = 0 : i64, scratch_operands = 0 : i64, tpu.core_type = #tpu.core_type<tc>} {
    %c0 = arith.constant 0 : index
    %c0_0 = arith.constant 0 : index
    %0 = vector.load %arg4[%c0, %c0_0] : memref<1x32xf32, #tpu.memory_space<vmem>>, vector<1x32xf32>
    %c0_1 = arith.constant 0 : index
    %c0_2 = arith.constant 0 : index
    %1 = vector.load %arg5[%c0_1, %c0_2] : memref<1x32xf32, #tpu.memory_space<vmem>>, vector<1x32xf32>
    %2 = tpu.iota {dimensions = array<i32: 1>} : vector<1x128xi32>
    %c64_i32 = arith.constant 64 : i32
    %3 = vector.broadcast %c64_i32 : i32 to vector<1x128xi32>
    %4 = arith.cmpi sge, %2, %3 : vector<1x128xi32>
    %c96_i32 = arith.constant 96 : i32
    %5 = vector.broadcast %c96_i32 : i32 to vector<1x128xi32>
    %6 = arith.cmpi slt, %2, %5 : vector<1x128xi32>
    %7 = arith.andi %4, %6 : vector<1x128xi1>
    %cst = arith.constant 1.000000e+00 : f32
    %cst_3 = arith.constant 5.000000e-01 : f32
    %8 = vector.broadcast %cst : f32 to vector<1x128xf32>
    %9 = vector.broadcast %cst_3 : f32 to vector<1x128xf32>
    %10 = arith.select %7, %8, %9 : vector<1x128xi1>, vector<1x128xf32>
    %cst_4 = arith.constant 0.000000e+00 : f32
    %cst_5 = arith.constant 5.000000e-01 : f32
    %11 = vector.broadcast %cst_4 : f32 to vector<1x128xf32>
    %12 = vector.broadcast %cst_5 : f32 to vector<1x128xf32>
    %13 = arith.select %7, %11, %12 : vector<1x128xi1>, vector<1x128xf32>
    %c0_6 = arith.constant 0 : index
    %c0_7 = arith.constant 0 : index
    %14 = vector.load %arg0[%c0_6, %c0_7] : memref<16x32xbf16, #tpu.memory_space<vmem>>, vector<16x32xbf16>
    %c0_8 = arith.constant 0 : index
    %c0_9 = arith.constant 0 : index
    %c0_10 = arith.constant 0 : index
    %15 = vector.load %arg1[%c0_8, %c0_9, %c0_10] : memref<2x32x128xbf16, #tpu.memory_space<vmem>>, vector<1x32x128xbf16>
    %16 = vector.shape_cast %15 : vector<1x32x128xbf16> to vector<32x128xbf16>
    %c0_11 = arith.constant 0 : index
    %c0_12 = arith.constant 0 : index
    %c0_13 = arith.constant 0 : index
    %17 = vector.load %arg2[%c0_11, %c0_12, %c0_13] : memref<2x32x128xbf16, #tpu.memory_space<vmem>>, vector<1x32x128xbf16>
    %18 = vector.shape_cast %17 : vector<1x32x128xbf16> to vector<32x128xbf16>
    %c0_14 = arith.constant 0 : index
    %c0_15 = arith.constant 0 : index
    %c0_16 = arith.constant 0 : index
    %19 = vector.load %arg3[%c0_14, %c0_15, %c0_16] : memref<2x1x128xf32, #tpu.memory_space<vmem>>, vector<1x1x128xf32>
    %20 = vector.shape_cast %19 : vector<1x1x128xf32> to vector<1x128xf32>
    %cst_17 = arith.constant dense<0.000000e+00> : vector<16x128xf32>
    %21 = tpu.matmul %14, %16, %cst_17 {dimension_numbers = #tpu.dot_dimension_numbers<[1], [0], [0], [1], [0, 0, 1, 1], [], []>} : vector<16x32xbf16>, vector<32x128xbf16>, vector<16x128xf32> -> vector<16x128xf32>
    %22 = vector.broadcast %20 : vector<1x128xf32> to vector<16x128xf32>
    %23 = arith.addf %21, %22 : vector<16x128xf32>
    %cst_18 = arith.constant 0.000000e+00 : f32
    %24 = vector.broadcast %cst_18 : f32 to vector<2x32xf32>
    %cst_19 = arith.constant 0.000000e+00 : f32
    %25 = vector.broadcast %cst_19 : f32 to vector<2x32xf32>
    %26 = vector.extract_strided_slice %23 {offsets = [0, 0], sizes = [2, 128], strides = [1, 1]} : vector<16x128xf32> to vector<2x128xf32>
    %27 = arith.truncf %24 : vector<2x32xf32> to vector<2x32xbf16>
    %cst_20 = arith.constant dense<0.000000e+00> : vector<2x128xf32>
    %28 = tpu.matmul %27, %18, %cst_20 {dimension_numbers = #tpu.dot_dimension_numbers<[1], [0], [0], [1], [0, 0, 1, 1], [], []>} : vector<2x32xbf16>, vector<32x128xbf16>, vector<2x128xf32> -> vector<2x128xf32>
    %29 = arith.addf %26, %28 : vector<2x128xf32>
    %30 = math.tanh %29 : vector<2x128xf32>
    %31 = vector.broadcast %10 : vector<1x128xf32> to vector<2x128xf32>
    %32 = arith.mulf %30, %31 : vector<2x128xf32>
    %33 = vector.broadcast %13 : vector<1x128xf32> to vector<2x128xf32>
    %34 = arith.addf %32, %33 : vector<2x128xf32>
    %35 = vector.extract_strided_slice %34 {offsets = [0, 0], sizes = [2, 32], strides = [1, 1]} : vector<2x128xf32> to vector<2x32xf32>
    %36 = vector.extract_strided_slice %34 {offsets = [0, 32], sizes = [2, 32], strides = [1, 1]} : vector<2x128xf32> to vector<2x32xf32>
    %37 = vector.extract_strided_slice %34 {offsets = [0, 64], sizes = [2, 32], strides = [1, 1]} : vector<2x128xf32> to vector<2x32xf32>
    %38 = vector.extract_strided_slice %34 {offsets = [0, 96], sizes = [2, 32], strides = [1, 1]} : vector<2x128xf32> to vector<2x32xf32>
    %39 = arith.mulf %36, %25 : vector<2x32xf32>
    %40 = arith.mulf %35, %37 : vector<2x32xf32>
    %41 = arith.addf %39, %40 : vector<2x32xf32>
    %42 = math.tanh %41 : vector<2x32xf32>
    %43 = arith.mulf %38, %42 : vector<2x32xf32>
    %44 = vector.extract_strided_slice %23 {offsets = [2, 0], sizes = [2, 128], strides = [1, 1]} : vector<16x128xf32> to vector<2x128xf32>
    %45 = arith.truncf %43 : vector<2x32xf32> to vector<2x32xbf16>
    %cst_21 = arith.constant dense<0.000000e+00> : vector<2x128xf32>
    %46 = tpu.matmul %45, %18, %cst_21 {dimension_numbers = #tpu.dot_dimension_numbers<[1], [0], [0], [1], [0, 0, 1, 1], [], []>} : vector<2x32xbf16>, vector<32x128xbf16>, vector<2x128xf32> -> vector<2x128xf32>
    %47 = arith.addf %44, %46 : vector<2x128xf32>
    %48 = math.tanh %47 : vector<2x128xf32>
    %49 = vector.broadcast %10 : vector<1x128xf32> to vector<2x128xf32>
    %50 = arith.mulf %48, %49 : vector<2x128xf32>
    %51 = vector.broadcast %13 : vector<1x128xf32> to vector<2x128xf32>
    %52 = arith.addf %50, %51 : vector<2x128xf32>
    %53 = vector.extract_strided_slice %52 {offsets = [0, 0], sizes = [2, 32], strides = [1, 1]} : vector<2x128xf32> to vector<2x32xf32>
    %54 = vector.extract_strided_slice %52 {offsets = [0, 32], sizes = [2, 32], strides = [1, 1]} : vector<2x128xf32> to vector<2x32xf32>
    %55 = vector.extract_strided_slice %52 {offsets = [0, 64], sizes = [2, 32], strides = [1, 1]} : vector<2x128xf32> to vector<2x32xf32>
    %56 = vector.extract_strided_slice %52 {offsets = [0, 96], sizes = [2, 32], strides = [1, 1]} : vector<2x128xf32> to vector<2x32xf32>
    %57 = arith.mulf %54, %41 : vector<2x32xf32>
    %58 = arith.mulf %53, %55 : vector<2x32xf32>
    %59 = arith.addf %57, %58 : vector<2x32xf32>
    %60 = math.tanh %59 : vector<2x32xf32>
    %61 = arith.mulf %56, %60 : vector<2x32xf32>
    %62 = vector.extract_strided_slice %23 {offsets = [4, 0], sizes = [2, 128], strides = [1, 1]} : vector<16x128xf32> to vector<2x128xf32>
    %63 = arith.truncf %61 : vector<2x32xf32> to vector<2x32xbf16>
    %cst_22 = arith.constant dense<0.000000e+00> : vector<2x128xf32>
    %64 = tpu.matmul %63, %18, %cst_22 {dimension_numbers = #tpu.dot_dimension_numbers<[1], [0], [0], [1], [0, 0, 1, 1], [], []>} : vector<2x32xbf16>, vector<32x128xbf16>, vector<2x128xf32> -> vector<2x128xf32>
    %65 = arith.addf %62, %64 : vector<2x128xf32>
    %66 = math.tanh %65 : vector<2x128xf32>
    %67 = vector.broadcast %10 : vector<1x128xf32> to vector<2x128xf32>
    %68 = arith.mulf %66, %67 : vector<2x128xf32>
    %69 = vector.broadcast %13 : vector<1x128xf32> to vector<2x128xf32>
    %70 = arith.addf %68, %69 : vector<2x128xf32>
    %71 = vector.extract_strided_slice %70 {offsets = [0, 0], sizes = [2, 32], strides = [1, 1]} : vector<2x128xf32> to vector<2x32xf32>
    %72 = vector.extract_strided_slice %70 {offsets = [0, 32], sizes = [2, 32], strides = [1, 1]} : vector<2x128xf32> to vector<2x32xf32>
    %73 = vector.extract_strided_slice %70 {offsets = [0, 64], sizes = [2, 32], strides = [1, 1]} : vector<2x128xf32> to vector<2x32xf32>
    %74 = vector.extract_strided_slice %70 {offsets = [0, 96], sizes = [2, 32], strides = [1, 1]} : vector<2x128xf32> to vector<2x32xf32>
    %75 = arith.mulf %72, %59 : vector<2x32xf32>
    %76 = arith.mulf %71, %73 : vector<2x32xf32>
    %77 = arith.addf %75, %76 : vector<2x32xf32>
    %78 = math.tanh %77 : vector<2x32xf32>
    %79 = arith.mulf %74, %78 : vector<2x32xf32>
    %80 = vector.extract_strided_slice %23 {offsets = [6, 0], sizes = [2, 128], strides = [1, 1]} : vector<16x128xf32> to vector<2x128xf32>
    %81 = arith.truncf %79 : vector<2x32xf32> to vector<2x32xbf16>
    %cst_23 = arith.constant dense<0.000000e+00> : vector<2x128xf32>
    %82 = tpu.matmul %81, %18, %cst_23 {dimension_numbers = #tpu.dot_dimension_numbers<[1], [0], [0], [1], [0, 0, 1, 1], [], []>} : vector<2x32xbf16>, vector<32x128xbf16>, vector<2x128xf32> -> vector<2x128xf32>
    %83 = arith.addf %80, %82 : vector<2x128xf32>
    %84 = math.tanh %83 : vector<2x128xf32>
    %85 = vector.broadcast %10 : vector<1x128xf32> to vector<2x128xf32>
    %86 = arith.mulf %84, %85 : vector<2x128xf32>
    %87 = vector.broadcast %13 : vector<1x128xf32> to vector<2x128xf32>
    %88 = arith.addf %86, %87 : vector<2x128xf32>
    %89 = vector.extract_strided_slice %88 {offsets = [0, 0], sizes = [2, 32], strides = [1, 1]} : vector<2x128xf32> to vector<2x32xf32>
    %90 = vector.extract_strided_slice %88 {offsets = [0, 32], sizes = [2, 32], strides = [1, 1]} : vector<2x128xf32> to vector<2x32xf32>
    %91 = vector.extract_strided_slice %88 {offsets = [0, 64], sizes = [2, 32], strides = [1, 1]} : vector<2x128xf32> to vector<2x32xf32>
    %92 = vector.extract_strided_slice %88 {offsets = [0, 96], sizes = [2, 32], strides = [1, 1]} : vector<2x128xf32> to vector<2x32xf32>
    %93 = arith.mulf %90, %77 : vector<2x32xf32>
    %94 = arith.mulf %89, %91 : vector<2x32xf32>
    %95 = arith.addf %93, %94 : vector<2x32xf32>
    %96 = math.tanh %95 : vector<2x32xf32>
    %97 = arith.mulf %92, %96 : vector<2x32xf32>
    %98 = vector.extract_strided_slice %23 {offsets = [8, 0], sizes = [2, 128], strides = [1, 1]} : vector<16x128xf32> to vector<2x128xf32>
    %99 = arith.truncf %97 : vector<2x32xf32> to vector<2x32xbf16>
    %cst_24 = arith.constant dense<0.000000e+00> : vector<2x128xf32>
    %100 = tpu.matmul %99, %18, %cst_24 {dimension_numbers = #tpu.dot_dimension_numbers<[1], [0], [0], [1], [0, 0, 1, 1], [], []>} : vector<2x32xbf16>, vector<32x128xbf16>, vector<2x128xf32> -> vector<2x128xf32>
    %101 = arith.addf %98, %100 : vector<2x128xf32>
    %102 = math.tanh %101 : vector<2x128xf32>
    %103 = vector.broadcast %10 : vector<1x128xf32> to vector<2x128xf32>
    %104 = arith.mulf %102, %103 : vector<2x128xf32>
    %105 = vector.broadcast %13 : vector<1x128xf32> to vector<2x128xf32>
    %106 = arith.addf %104, %105 : vector<2x128xf32>
    %107 = vector.extract_strided_slice %106 {offsets = [0, 0], sizes = [2, 32], strides = [1, 1]} : vector<2x128xf32> to vector<2x32xf32>
    %108 = vector.extract_strided_slice %106 {offsets = [0, 32], sizes = [2, 32], strides = [1, 1]} : vector<2x128xf32> to vector<2x32xf32>
    %109 = vector.extract_strided_slice %106 {offsets = [0, 64], sizes = [2, 32], strides = [1, 1]} : vector<2x128xf32> to vector<2x32xf32>
    %110 = vector.extract_strided_slice %106 {offsets = [0, 96], sizes = [2, 32], strides = [1, 1]} : vector<2x128xf32> to vector<2x32xf32>
    %111 = arith.mulf %108, %95 : vector<2x32xf32>
    %112 = arith.mulf %107, %109 : vector<2x32xf32>
    %113 = arith.addf %111, %112 : vector<2x32xf32>
    %114 = math.tanh %113 : vector<2x32xf32>
    %115 = arith.mulf %110, %114 : vector<2x32xf32>
    %116 = vector.extract_strided_slice %23 {offsets = [10, 0], sizes = [2, 128], strides = [1, 1]} : vector<16x128xf32> to vector<2x128xf32>
    %117 = arith.truncf %115 : vector<2x32xf32> to vector<2x32xbf16>
    %cst_25 = arith.constant dense<0.000000e+00> : vector<2x128xf32>
    %118 = tpu.matmul %117, %18, %cst_25 {dimension_numbers = #tpu.dot_dimension_numbers<[1], [0], [0], [1], [0, 0, 1, 1], [], []>} : vector<2x32xbf16>, vector<32x128xbf16>, vector<2x128xf32> -> vector<2x128xf32>
    %119 = arith.addf %116, %118 : vector<2x128xf32>
    %120 = math.tanh %119 : vector<2x128xf32>
    %121 = vector.broadcast %10 : vector<1x128xf32> to vector<2x128xf32>
    %122 = arith.mulf %120, %121 : vector<2x128xf32>
    %123 = vector.broadcast %13 : vector<1x128xf32> to vector<2x128xf32>
    %124 = arith.addf %122, %123 : vector<2x128xf32>
    %125 = vector.extract_strided_slice %124 {offsets = [0, 0], sizes = [2, 32], strides = [1, 1]} : vector<2x128xf32> to vector<2x32xf32>
    %126 = vector.extract_strided_slice %124 {offsets = [0, 32], sizes = [2, 32], strides = [1, 1]} : vector<2x128xf32> to vector<2x32xf32>
    %127 = vector.extract_strided_slice %124 {offsets = [0, 64], sizes = [2, 32], strides = [1, 1]} : vector<2x128xf32> to vector<2x32xf32>
    %128 = vector.extract_strided_slice %124 {offsets = [0, 96], sizes = [2, 32], strides = [1, 1]} : vector<2x128xf32> to vector<2x32xf32>
    %129 = arith.mulf %126, %113 : vector<2x32xf32>
    %130 = arith.mulf %125, %127 : vector<2x32xf32>
    %131 = arith.addf %129, %130 : vector<2x32xf32>
    %132 = math.tanh %131 : vector<2x32xf32>
    %133 = arith.mulf %128, %132 : vector<2x32xf32>
    %134 = vector.extract_strided_slice %23 {offsets = [12, 0], sizes = [2, 128], strides = [1, 1]} : vector<16x128xf32> to vector<2x128xf32>
    %135 = arith.truncf %133 : vector<2x32xf32> to vector<2x32xbf16>
    %cst_26 = arith.constant dense<0.000000e+00> : vector<2x128xf32>
    %136 = tpu.matmul %135, %18, %cst_26 {dimension_numbers = #tpu.dot_dimension_numbers<[1], [0], [0], [1], [0, 0, 1, 1], [], []>} : vector<2x32xbf16>, vector<32x128xbf16>, vector<2x128xf32> -> vector<2x128xf32>
    %137 = arith.addf %134, %136 : vector<2x128xf32>
    %138 = math.tanh %137 : vector<2x128xf32>
    %139 = vector.broadcast %10 : vector<1x128xf32> to vector<2x128xf32>
    %140 = arith.mulf %138, %139 : vector<2x128xf32>
    %141 = vector.broadcast %13 : vector<1x128xf32> to vector<2x128xf32>
    %142 = arith.addf %140, %141 : vector<2x128xf32>
    %143 = vector.extract_strided_slice %142 {offsets = [0, 0], sizes = [2, 32], strides = [1, 1]} : vector<2x128xf32> to vector<2x32xf32>
    %144 = vector.extract_strided_slice %142 {offsets = [0, 32], sizes = [2, 32], strides = [1, 1]} : vector<2x128xf32> to vector<2x32xf32>
    %145 = vector.extract_strided_slice %142 {offsets = [0, 64], sizes = [2, 32], strides = [1, 1]} : vector<2x128xf32> to vector<2x32xf32>
    %146 = vector.extract_strided_slice %142 {offsets = [0, 96], sizes = [2, 32], strides = [1, 1]} : vector<2x128xf32> to vector<2x32xf32>
    %147 = arith.mulf %144, %131 : vector<2x32xf32>
    %148 = arith.mulf %143, %145 : vector<2x32xf32>
    %149 = arith.addf %147, %148 : vector<2x32xf32>
    %150 = math.tanh %149 : vector<2x32xf32>
    %151 = arith.mulf %146, %150 : vector<2x32xf32>
    %152 = vector.extract_strided_slice %23 {offsets = [14, 0], sizes = [2, 128], strides = [1, 1]} : vector<16x128xf32> to vector<2x128xf32>
    %153 = arith.truncf %151 : vector<2x32xf32> to vector<2x32xbf16>
    %cst_27 = arith.constant dense<0.000000e+00> : vector<2x128xf32>
    %154 = tpu.matmul %153, %18, %cst_27 {dimension_numbers = #tpu.dot_dimension_numbers<[1], [0], [0], [1], [0, 0, 1, 1], [], []>} : vector<2x32xbf16>, vector<32x128xbf16>, vector<2x128xf32> -> vector<2x128xf32>
    %155 = arith.addf %152, %154 : vector<2x128xf32>
    %156 = math.tanh %155 : vector<2x128xf32>
    %157 = vector.broadcast %10 : vector<1x128xf32> to vector<2x128xf32>
    %158 = arith.mulf %156, %157 : vector<2x128xf32>
    %159 = vector.broadcast %13 : vector<1x128xf32> to vector<2x128xf32>
    %160 = arith.addf %158, %159 : vector<2x128xf32>
    %161 = vector.extract_strided_slice %160 {offsets = [0, 0], sizes = [2, 32], strides = [1, 1]} : vector<2x128xf32> to vector<2x32xf32>
    %162 = vector.extract_strided_slice %160 {offsets = [0, 32], sizes = [2, 32], strides = [1, 1]} : vector<2x128xf32> to vector<2x32xf32>
    %163 = vector.extract_strided_slice %160 {offsets = [0, 64], sizes = [2, 32], strides = [1, 1]} : vector<2x128xf32> to vector<2x32xf32>
    %164 = vector.extract_strided_slice %160 {offsets = [0, 96], sizes = [2, 32], strides = [1, 1]} : vector<2x128xf32> to vector<2x32xf32>
    %165 = arith.mulf %162, %149 : vector<2x32xf32>
    %166 = arith.mulf %161, %163 : vector<2x32xf32>
    %167 = arith.addf %165, %166 : vector<2x32xf32>
    %168 = math.tanh %167 : vector<2x32xf32>
    %169 = arith.mulf %164, %168 : vector<2x32xf32>
    %170 = tpu.concatenate %43, %61, %79, %97, %115, %133, %151, %169 in 0 : vector<2x32xf32>, vector<2x32xf32>, vector<2x32xf32>, vector<2x32xf32>, vector<2x32xf32>, vector<2x32xf32>, vector<2x32xf32>, vector<2x32xf32> -> vector<16x32xf32>
    %c1 = arith.constant 1 : index
    %c0_28 = arith.constant 0 : index
    %c0_29 = arith.constant 0 : index
    %171 = vector.load %arg1[%c1, %c0_28, %c0_29] : memref<2x32x128xbf16, #tpu.memory_space<vmem>>, vector<1x32x128xbf16>
    %172 = vector.shape_cast %171 : vector<1x32x128xbf16> to vector<32x128xbf16>
    %c1_30 = arith.constant 1 : index
    %c0_31 = arith.constant 0 : index
    %c0_32 = arith.constant 0 : index
    %173 = vector.load %arg2[%c1_30, %c0_31, %c0_32] : memref<2x32x128xbf16, #tpu.memory_space<vmem>>, vector<1x32x128xbf16>
    %174 = vector.shape_cast %173 : vector<1x32x128xbf16> to vector<32x128xbf16>
    %c1_33 = arith.constant 1 : index
    %c0_34 = arith.constant 0 : index
    %c0_35 = arith.constant 0 : index
    %175 = vector.load %arg3[%c1_33, %c0_34, %c0_35] : memref<2x1x128xf32, #tpu.memory_space<vmem>>, vector<1x1x128xf32>
    %176 = vector.shape_cast %175 : vector<1x1x128xf32> to vector<1x128xf32>
    %177 = arith.truncf %170 : vector<16x32xf32> to vector<16x32xbf16>
    %cst_36 = arith.constant dense<0.000000e+00> : vector<16x128xf32>
    %178 = tpu.matmul %177, %172, %cst_36 {dimension_numbers = #tpu.dot_dimension_numbers<[1], [0], [0], [1], [0, 0, 1, 1], [], []>} : vector<16x32xbf16>, vector<32x128xbf16>, vector<16x128xf32> -> vector<16x128xf32>
    %179 = vector.broadcast %176 : vector<1x128xf32> to vector<16x128xf32>
    %180 = arith.addf %178, %179 : vector<16x128xf32>
    %cst_37 = arith.constant 0.000000e+00 : f32
    %181 = vector.broadcast %cst_37 : f32 to vector<2x32xf32>
    %cst_38 = arith.constant 0.000000e+00 : f32
    %182 = vector.broadcast %cst_38 : f32 to vector<2x32xf32>
    %183 = vector.extract_strided_slice %180 {offsets = [0, 0], sizes = [2, 128], strides = [1, 1]} : vector<16x128xf32> to vector<2x128xf32>
    %184 = arith.truncf %181 : vector<2x32xf32> to vector<2x32xbf16>
    %cst_39 = arith.constant dense<0.000000e+00> : vector<2x128xf32>
    %185 = tpu.matmul %184, %174, %cst_39 {dimension_numbers = #tpu.dot_dimension_numbers<[1], [0], [0], [1], [0, 0, 1, 1], [], []>} : vector<2x32xbf16>, vector<32x128xbf16>, vector<2x128xf32> -> vector<2x128xf32>
    %186 = arith.addf %183, %185 : vector<2x128xf32>
    %187 = math.tanh %186 : vector<2x128xf32>
    %188 = vector.broadcast %10 : vector<1x128xf32> to vector<2x128xf32>
    %189 = arith.mulf %187, %188 : vector<2x128xf32>
    %190 = vector.broadcast %13 : vector<1x128xf32> to vector<2x128xf32>
    %191 = arith.addf %189, %190 : vector<2x128xf32>
    %192 = vector.extract_strided_slice %191 {offsets = [0, 0], sizes = [2, 32], strides = [1, 1]} : vector<2x128xf32> to vector<2x32xf32>
    %193 = vector.extract_strided_slice %191 {offsets = [0, 32], sizes = [2, 32], strides = [1, 1]} : vector<2x128xf32> to vector<2x32xf32>
    %194 = vector.extract_strided_slice %191 {offsets = [0, 64], sizes = [2, 32], strides = [1, 1]} : vector<2x128xf32> to vector<2x32xf32>
    %195 = vector.extract_strided_slice %191 {offsets = [0, 96], sizes = [2, 32], strides = [1, 1]} : vector<2x128xf32> to vector<2x32xf32>
    %196 = arith.mulf %193, %182 : vector<2x32xf32>
    %197 = arith.mulf %192, %194 : vector<2x32xf32>
    %198 = arith.addf %196, %197 : vector<2x32xf32>
    %199 = math.tanh %198 : vector<2x32xf32>
    %200 = arith.mulf %195, %199 : vector<2x32xf32>
    %201 = vector.extract_strided_slice %180 {offsets = [2, 0], sizes = [2, 128], strides = [1, 1]} : vector<16x128xf32> to vector<2x128xf32>
    %202 = arith.truncf %200 : vector<2x32xf32> to vector<2x32xbf16>
    %cst_40 = arith.constant dense<0.000000e+00> : vector<2x128xf32>
    %203 = tpu.matmul %202, %174, %cst_40 {dimension_numbers = #tpu.dot_dimension_numbers<[1], [0], [0], [1], [0, 0, 1, 1], [], []>} : vector<2x32xbf16>, vector<32x128xbf16>, vector<2x128xf32> -> vector<2x128xf32>
    %204 = arith.addf %201, %203 : vector<2x128xf32>
    %205 = math.tanh %204 : vector<2x128xf32>
    %206 = vector.broadcast %10 : vector<1x128xf32> to vector<2x128xf32>
    %207 = arith.mulf %205, %206 : vector<2x128xf32>
    %208 = vector.broadcast %13 : vector<1x128xf32> to vector<2x128xf32>
    %209 = arith.addf %207, %208 : vector<2x128xf32>
    %210 = vector.extract_strided_slice %209 {offsets = [0, 0], sizes = [2, 32], strides = [1, 1]} : vector<2x128xf32> to vector<2x32xf32>
    %211 = vector.extract_strided_slice %209 {offsets = [0, 32], sizes = [2, 32], strides = [1, 1]} : vector<2x128xf32> to vector<2x32xf32>
    %212 = vector.extract_strided_slice %209 {offsets = [0, 64], sizes = [2, 32], strides = [1, 1]} : vector<2x128xf32> to vector<2x32xf32>
    %213 = vector.extract_strided_slice %209 {offsets = [0, 96], sizes = [2, 32], strides = [1, 1]} : vector<2x128xf32> to vector<2x32xf32>
    %214 = arith.mulf %211, %198 : vector<2x32xf32>
    %215 = arith.mulf %210, %212 : vector<2x32xf32>
    %216 = arith.addf %214, %215 : vector<2x32xf32>
    %217 = math.tanh %216 : vector<2x32xf32>
    %218 = arith.mulf %213, %217 : vector<2x32xf32>
    %219 = vector.extract_strided_slice %180 {offsets = [4, 0], sizes = [2, 128], strides = [1, 1]} : vector<16x128xf32> to vector<2x128xf32>
    %220 = arith.truncf %218 : vector<2x32xf32> to vector<2x32xbf16>
    %cst_41 = arith.constant dense<0.000000e+00> : vector<2x128xf32>
    %221 = tpu.matmul %220, %174, %cst_41 {dimension_numbers = #tpu.dot_dimension_numbers<[1], [0], [0], [1], [0, 0, 1, 1], [], []>} : vector<2x32xbf16>, vector<32x128xbf16>, vector<2x128xf32> -> vector<2x128xf32>
    %222 = arith.addf %219, %221 : vector<2x128xf32>
    %223 = math.tanh %222 : vector<2x128xf32>
    %224 = vector.broadcast %10 : vector<1x128xf32> to vector<2x128xf32>
    %225 = arith.mulf %223, %224 : vector<2x128xf32>
    %226 = vector.broadcast %13 : vector<1x128xf32> to vector<2x128xf32>
    %227 = arith.addf %225, %226 : vector<2x128xf32>
    %228 = vector.extract_strided_slice %227 {offsets = [0, 0], sizes = [2, 32], strides = [1, 1]} : vector<2x128xf32> to vector<2x32xf32>
    %229 = vector.extract_strided_slice %227 {offsets = [0, 32], sizes = [2, 32], strides = [1, 1]} : vector<2x128xf32> to vector<2x32xf32>
    %230 = vector.extract_strided_slice %227 {offsets = [0, 64], sizes = [2, 32], strides = [1, 1]} : vector<2x128xf32> to vector<2x32xf32>
    %231 = vector.extract_strided_slice %227 {offsets = [0, 96], sizes = [2, 32], strides = [1, 1]} : vector<2x128xf32> to vector<2x32xf32>
    %232 = arith.mulf %229, %216 : vector<2x32xf32>
    %233 = arith.mulf %228, %230 : vector<2x32xf32>
    %234 = arith.addf %232, %233 : vector<2x32xf32>
    %235 = math.tanh %234 : vector<2x32xf32>
    %236 = arith.mulf %231, %235 : vector<2x32xf32>
    %237 = vector.extract_strided_slice %180 {offsets = [6, 0], sizes = [2, 128], strides = [1, 1]} : vector<16x128xf32> to vector<2x128xf32>
    %238 = arith.truncf %236 : vector<2x32xf32> to vector<2x32xbf16>
    %cst_42 = arith.constant dense<0.000000e+00> : vector<2x128xf32>
    %239 = tpu.matmul %238, %174, %cst_42 {dimension_numbers = #tpu.dot_dimension_numbers<[1], [0], [0], [1], [0, 0, 1, 1], [], []>} : vector<2x32xbf16>, vector<32x128xbf16>, vector<2x128xf32> -> vector<2x128xf32>
    %240 = arith.addf %237, %239 : vector<2x128xf32>
    %241 = math.tanh %240 : vector<2x128xf32>
    %242 = vector.broadcast %10 : vector<1x128xf32> to vector<2x128xf32>
    %243 = arith.mulf %241, %242 : vector<2x128xf32>
    %244 = vector.broadcast %13 : vector<1x128xf32> to vector<2x128xf32>
    %245 = arith.addf %243, %244 : vector<2x128xf32>
    %246 = vector.extract_strided_slice %245 {offsets = [0, 0], sizes = [2, 32], strides = [1, 1]} : vector<2x128xf32> to vector<2x32xf32>
    %247 = vector.extract_strided_slice %245 {offsets = [0, 32], sizes = [2, 32], strides = [1, 1]} : vector<2x128xf32> to vector<2x32xf32>
    %248 = vector.extract_strided_slice %245 {offsets = [0, 64], sizes = [2, 32], strides = [1, 1]} : vector<2x128xf32> to vector<2x32xf32>
    %249 = vector.extract_strided_slice %245 {offsets = [0, 96], sizes = [2, 32], strides = [1, 1]} : vector<2x128xf32> to vector<2x32xf32>
    %250 = arith.mulf %247, %234 : vector<2x32xf32>
    %251 = arith.mulf %246, %248 : vector<2x32xf32>
    %252 = arith.addf %250, %251 : vector<2x32xf32>
    %253 = math.tanh %252 : vector<2x32xf32>
    %254 = arith.mulf %249, %253 : vector<2x32xf32>
    %255 = vector.extract_strided_slice %180 {offsets = [8, 0], sizes = [2, 128], strides = [1, 1]} : vector<16x128xf32> to vector<2x128xf32>
    %256 = arith.truncf %254 : vector<2x32xf32> to vector<2x32xbf16>
    %cst_43 = arith.constant dense<0.000000e+00> : vector<2x128xf32>
    %257 = tpu.matmul %256, %174, %cst_43 {dimension_numbers = #tpu.dot_dimension_numbers<[1], [0], [0], [1], [0, 0, 1, 1], [], []>} : vector<2x32xbf16>, vector<32x128xbf16>, vector<2x128xf32> -> vector<2x128xf32>
    %258 = arith.addf %255, %257 : vector<2x128xf32>
    %259 = math.tanh %258 : vector<2x128xf32>
    %260 = vector.broadcast %10 : vector<1x128xf32> to vector<2x128xf32>
    %261 = arith.mulf %259, %260 : vector<2x128xf32>
    %262 = vector.broadcast %13 : vector<1x128xf32> to vector<2x128xf32>
    %263 = arith.addf %261, %262 : vector<2x128xf32>
    %264 = vector.extract_strided_slice %263 {offsets = [0, 0], sizes = [2, 32], strides = [1, 1]} : vector<2x128xf32> to vector<2x32xf32>
    %265 = vector.extract_strided_slice %263 {offsets = [0, 32], sizes = [2, 32], strides = [1, 1]} : vector<2x128xf32> to vector<2x32xf32>
    %266 = vector.extract_strided_slice %263 {offsets = [0, 64], sizes = [2, 32], strides = [1, 1]} : vector<2x128xf32> to vector<2x32xf32>
    %267 = vector.extract_strided_slice %263 {offsets = [0, 96], sizes = [2, 32], strides = [1, 1]} : vector<2x128xf32> to vector<2x32xf32>
    %268 = arith.mulf %265, %252 : vector<2x32xf32>
    %269 = arith.mulf %264, %266 : vector<2x32xf32>
    %270 = arith.addf %268, %269 : vector<2x32xf32>
    %271 = math.tanh %270 : vector<2x32xf32>
    %272 = arith.mulf %267, %271 : vector<2x32xf32>
    %273 = vector.extract_strided_slice %180 {offsets = [10, 0], sizes = [2, 128], strides = [1, 1]} : vector<16x128xf32> to vector<2x128xf32>
    %274 = arith.truncf %272 : vector<2x32xf32> to vector<2x32xbf16>
    %cst_44 = arith.constant dense<0.000000e+00> : vector<2x128xf32>
    %275 = tpu.matmul %274, %174, %cst_44 {dimension_numbers = #tpu.dot_dimension_numbers<[1], [0], [0], [1], [0, 0, 1, 1], [], []>} : vector<2x32xbf16>, vector<32x128xbf16>, vector<2x128xf32> -> vector<2x128xf32>
    %276 = arith.addf %273, %275 : vector<2x128xf32>
    %277 = math.tanh %276 : vector<2x128xf32>
    %278 = vector.broadcast %10 : vector<1x128xf32> to vector<2x128xf32>
    %279 = arith.mulf %277, %278 : vector<2x128xf32>
    %280 = vector.broadcast %13 : vector<1x128xf32> to vector<2x128xf32>
    %281 = arith.addf %279, %280 : vector<2x128xf32>
    %282 = vector.extract_strided_slice %281 {offsets = [0, 0], sizes = [2, 32], strides = [1, 1]} : vector<2x128xf32> to vector<2x32xf32>
    %283 = vector.extract_strided_slice %281 {offsets = [0, 32], sizes = [2, 32], strides = [1, 1]} : vector<2x128xf32> to vector<2x32xf32>
    %284 = vector.extract_strided_slice %281 {offsets = [0, 64], sizes = [2, 32], strides = [1, 1]} : vector<2x128xf32> to vector<2x32xf32>
    %285 = vector.extract_strided_slice %281 {offsets = [0, 96], sizes = [2, 32], strides = [1, 1]} : vector<2x128xf32> to vector<2x32xf32>
    %286 = arith.mulf %283, %270 : vector<2x32xf32>
    %287 = arith.mulf %282, %284 : vector<2x32xf32>
    %288 = arith.addf %286, %287 : vector<2x32xf32>
    %289 = math.tanh %288 : vector<2x32xf32>
    %290 = arith.mulf %285, %289 : vector<2x32xf32>
    %291 = vector.extract_strided_slice %180 {offsets = [12, 0], sizes = [2, 128], strides = [1, 1]} : vector<16x128xf32> to vector<2x128xf32>
    %292 = arith.truncf %290 : vector<2x32xf32> to vector<2x32xbf16>
    %cst_45 = arith.constant dense<0.000000e+00> : vector<2x128xf32>
    %293 = tpu.matmul %292, %174, %cst_45 {dimension_numbers = #tpu.dot_dimension_numbers<[1], [0], [0], [1], [0, 0, 1, 1], [], []>} : vector<2x32xbf16>, vector<32x128xbf16>, vector<2x128xf32> -> vector<2x128xf32>
    %294 = arith.addf %291, %293 : vector<2x128xf32>
    %295 = math.tanh %294 : vector<2x128xf32>
    %296 = vector.broadcast %10 : vector<1x128xf32> to vector<2x128xf32>
    %297 = arith.mulf %295, %296 : vector<2x128xf32>
    %298 = vector.broadcast %13 : vector<1x128xf32> to vector<2x128xf32>
    %299 = arith.addf %297, %298 : vector<2x128xf32>
    %300 = vector.extract_strided_slice %299 {offsets = [0, 0], sizes = [2, 32], strides = [1, 1]} : vector<2x128xf32> to vector<2x32xf32>
    %301 = vector.extract_strided_slice %299 {offsets = [0, 32], sizes = [2, 32], strides = [1, 1]} : vector<2x128xf32> to vector<2x32xf32>
    %302 = vector.extract_strided_slice %299 {offsets = [0, 64], sizes = [2, 32], strides = [1, 1]} : vector<2x128xf32> to vector<2x32xf32>
    %303 = vector.extract_strided_slice %299 {offsets = [0, 96], sizes = [2, 32], strides = [1, 1]} : vector<2x128xf32> to vector<2x32xf32>
    %304 = arith.mulf %301, %288 : vector<2x32xf32>
    %305 = arith.mulf %300, %302 : vector<2x32xf32>
    %306 = arith.addf %304, %305 : vector<2x32xf32>
    %307 = math.tanh %306 : vector<2x32xf32>
    %308 = arith.mulf %303, %307 : vector<2x32xf32>
    %309 = vector.extract_strided_slice %180 {offsets = [14, 0], sizes = [2, 128], strides = [1, 1]} : vector<16x128xf32> to vector<2x128xf32>
    %310 = arith.truncf %308 : vector<2x32xf32> to vector<2x32xbf16>
    %cst_46 = arith.constant dense<0.000000e+00> : vector<2x128xf32>
    %311 = tpu.matmul %310, %174, %cst_46 {dimension_numbers = #tpu.dot_dimension_numbers<[1], [0], [0], [1], [0, 0, 1, 1], [], []>} : vector<2x32xbf16>, vector<32x128xbf16>, vector<2x128xf32> -> vector<2x128xf32>
    %312 = arith.addf %309, %311 : vector<2x128xf32>
    %313 = math.tanh %312 : vector<2x128xf32>
    %314 = vector.broadcast %10 : vector<1x128xf32> to vector<2x128xf32>
    %315 = arith.mulf %313, %314 : vector<2x128xf32>
    %316 = vector.broadcast %13 : vector<1x128xf32> to vector<2x128xf32>
    %317 = arith.addf %315, %316 : vector<2x128xf32>
    %318 = vector.extract_strided_slice %317 {offsets = [0, 0], sizes = [2, 32], strides = [1, 1]} : vector<2x128xf32> to vector<2x32xf32>
    %319 = vector.extract_strided_slice %317 {offsets = [0, 32], sizes = [2, 32], strides = [1, 1]} : vector<2x128xf32> to vector<2x32xf32>
    %320 = vector.extract_strided_slice %317 {offsets = [0, 64], sizes = [2, 32], strides = [1, 1]} : vector<2x128xf32> to vector<2x32xf32>
    %321 = vector.extract_strided_slice %317 {offsets = [0, 96], sizes = [2, 32], strides = [1, 1]} : vector<2x128xf32> to vector<2x32xf32>
    %322 = arith.mulf %319, %306 : vector<2x32xf32>
    %323 = arith.mulf %318, %320 : vector<2x32xf32>
    %324 = arith.addf %322, %323 : vector<2x32xf32>
    %325 = math.tanh %324 : vector<2x32xf32>
    %326 = arith.mulf %321, %325 : vector<2x32xf32>
    %327 = tpu.concatenate %169, %326, %167, %324 in 0 : vector<2x32xf32>, vector<2x32xf32>, vector<2x32xf32>, vector<2x32xf32> -> vector<8x32xf32>
    %cst_47 = arith.constant dense<0.000000e+00> : vector<8xf32>
    %328 = vector.multi_reduction <add>, %327, %cst_47 [1] : vector<8x32xf32> to vector<8xf32>
    %329 = vector.shape_cast %328 : vector<8xf32> to vector<8x1xf32>
    %cst_48 = arith.constant 3.200000e+01 : f32
    %330 = vector.broadcast %cst_48 : f32 to vector<8x1xf32>
    %331 = arith.divf %329, %330 : vector<8x1xf32>
    %332 = vector.broadcast %331 : vector<8x1xf32> to vector<8x32xf32>
    %333 = arith.subf %327, %332 : vector<8x32xf32>
    %334 = arith.mulf %333, %333 : vector<8x32xf32>
    %cst_49 = arith.constant dense<0.000000e+00> : vector<8xf32>
    %335 = vector.multi_reduction <add>, %334, %cst_49 [1] : vector<8x32xf32> to vector<8xf32>
    %336 = vector.shape_cast %335 : vector<8xf32> to vector<8x1xf32>
    %cst_50 = arith.constant 3.200000e+01 : f32
    %337 = vector.broadcast %cst_50 : f32 to vector<8x1xf32>
    %338 = arith.divf %336, %337 : vector<8x1xf32>
    %339 = vector.broadcast %331 : vector<8x1xf32> to vector<8x32xf32>
    %340 = arith.subf %327, %339 : vector<8x32xf32>
    %cst_51 = arith.constant 9.99999974E-6 : f32
    %341 = vector.broadcast %cst_51 : f32 to vector<8x1xf32>
    %342 = arith.addf %338, %341 : vector<8x1xf32>
    %343 = math.rsqrt %342 : vector<8x1xf32>
    %344 = vector.broadcast %343 : vector<8x1xf32> to vector<8x32xf32>
    %345 = arith.mulf %340, %344 : vector<8x32xf32>
    %346 = vector.broadcast %0 : vector<1x32xf32> to vector<8x32xf32>
    %347 = arith.mulf %345, %346 : vector<8x32xf32>
    %348 = vector.broadcast %1 : vector<1x32xf32> to vector<8x32xf32>
    %349 = arith.addf %347, %348 : vector<8x32xf32>
    %350 = vector.extract_strided_slice %349 {offsets = [0, 0], sizes = [2, 32], strides = [1, 1]} : vector<8x32xf32> to vector<2x32xf32>
    %351 = vector.extract_strided_slice %349 {offsets = [2, 0], sizes = [2, 32], strides = [1, 1]} : vector<8x32xf32> to vector<2x32xf32>
    %352 = vector.extract_strided_slice %349 {offsets = [4, 0], sizes = [2, 32], strides = [1, 1]} : vector<8x32xf32> to vector<2x32xf32>
    %353 = vector.extract_strided_slice %349 {offsets = [6, 0], sizes = [2, 32], strides = [1, 1]} : vector<8x32xf32> to vector<2x32xf32>
    %354 = tpu.concatenate %350, %351, %352, %353 in 1 : vector<2x32xf32>, vector<2x32xf32>, vector<2x32xf32>, vector<2x32xf32> -> vector<2x128xf32>
    %c0_52 = arith.constant 0 : index
    %c0_53 = arith.constant 0 : index
    %355 = vector.load %arg6[%c0_52, %c0_53] : memref<2x128xf32, #tpu.memory_space<vmem>>, vector<2x128xf32>
    tpu.vector_store %arg6[%c0_52, %c0_53], %354 {strides = array<i32>} : memref<2x128xf32, #tpu.memory_space<vmem>>, vector<2x128xf32>,
    return
  }
}

</mosaic_0001>

<bundles_post_ra>
// kernel: schedule_encoder_forward.1
= control target key start
LH: loop header
LB: loop body
LE: loop exit
PB: predicated region body
PF: predicated region fallthrough
CT: control target
= control target key end

     0   :  { %v1824_v1 = vmov 0.0   ;;  %vm1825_vm0 = vmmov 0   ;;  %vm68_vm1 = vcmask 261120   ;;  %s2210_s0 = inlined_call_operand.vmem [shape: bf16[16,32], index: 0, kind: input, shape index: {}]   ;;  %s2211_s1 = inlined_call_operand.vmem [shape: bf16[2,32,128], index: 1, kind: input, shape index: {}]   ;;  %s2212_s2 = inlined_call_operand.vmem [shape: bf16[2,32,128], index: 2, kind: input, shape index: {}]   ;;  %s2213_s3 = inlined_call_operand.vmem [shape: f32[2,1,128], index: 3, kind: input, shape index: {}]   ;;  %s2214_s4 = inlined_call_operand.vmem [shape: f32[1,32], index: 4, kind: input, shape index: {}]   ;;  %s2215_s5 = inlined_call_operand.vmem [shape: f32[1,32], index: 5, kind: input, shape index: {}]   ;;  %s2216_s6 = inlined_call_operand.hbm [shape: f32[2,128], index: 6, kind: output, shape index: {}]  }
   0x1   :  { %v1725_v0 = vld [vmem:[%s2211_s1] sm:$0xff]   ;;  %1573 = vmatprep.subr.bf16.mxu0 %v1824_v1  ;;  %1581 = vmatprep.subr.bf16.mxu1 %v1824_v1  ;;  %v1727_v3 = vld [vmem:[%s2211_s1 + $0x8] sm:$0xff]  }
   0x2   :  { %v1875_v2 = vld [vmem:[%s2212_s2] sm:$0xff]   ;;  %1574 = vmatpush3.bf16.msra.mxu0 %v1725_v0  ;;  %1577 = vmatprep.mubr.msk.bf16.mxu0 %vm1825_vm0, %v1824_v1  ;;  %v1887_v4 = vld [vmem:[%s2212_s2 + $0x8] sm:$0xff]  }
   0x3   :  { %1582 = vmatpush3.bf16.msra.mxu1 %v1875_v2  ;;  %1575 = vmatprep.subr.bf16.mxu0 %v1824_v1  ;;  %v1729_v5 = vld [vmem:[%s2210_s0] sm:$0xff]  }
   0x4   :  { %1583 = vmatprep.subr.bf16.mxu1 %v1824_v1  ;;  %1585 = vmatprep.mubr.msk.bf16.mxu1 %vm1825_vm0, %v1824_v1 }
   0x6   :  { %1576 = vmatpush3.bf16.msra.mxu0 %v1727_v3 }
   0x7   :  { %1584 = vmatpush3.bf16.msra.mxu1 %v1887_v4  ;;  %1589 = vmatprep.subr.bf16.mxu0 %v1824_v1 }
   0x8   :  { %1597 = vmatprep.subr.bf16.mxu1 %v1824_v1 }
   0x9   :  { %11 = vsyncpa [#allocation3], 0  ;;  %1578 = vmatmul.mubr.msk.bf16.vlgmr.msra.gmra.mrb[0].mxu0 %vm68_vm1, %v1729_v5  ;;  %v1826_v6 = vmov 0   ;;  %v1481_v7 = vld [vmem:[%s2213_s3] ss:$0 sm:$0xff]  ;;  %v27_v8 = vlaneseq  ;;  %v1827_v21 = vmov 0.5  }
   0xa   :  { %1586 = vmatmul.mubr.bf16.vlgmr.msra.gmra.mrb[0].mxu1 %v1826_v6  ;;  %1590 = vmatpush3.bf16.msra.mxu0 %v1875_v2  ;;  %s1828_s8 = smov 64   ;;  %s1829_s9 = smov 32   ;;  %vm709_vm5 = vcmask 1041408   ;;  %vm711_vm6 = vcmask 1043456   ;;  %vm713_vm7 = vcmask 1045504   ;;  %vm1462_vm8 = vcmask 523264  }
   0xb   :  { %1591 = vmatprep.subr.bf16.mxu0 %v1824_v1  ;;  %1593 = vmatprep.mubr.msk.bf16.mxu0 %vm1825_vm0, %v1824_v1  ;;  %v28_v19 = vand.u32 127, %v27_v8  ;;  %s1830_s19 = smov 96   ;;  %vm1464_vm9 = vcmask 785408  }
   0xc   :  { %1598 = vmatpush3.bf16.msra.mxu1 %v1875_v2  ;;  %1601 = vmatprep.mubr.msk.bf16.mxu1 %vm1825_vm0, %v1824_v1 }
   0xd   :  { %1599 = vmatprep.subr.bf16.mxu1 %v1824_v1  ;;  %vm29_vm2 = vcmp.ge.s32.totalorder %v28_v19, 64  ;;  %vm30_vm3 = vcmp.lt.s32.totalorder %v28_v19, 96 }
   0xe   :  { %1592 = vmatpush3.bf16.msra.mxu0 %v1887_v4  ;;  %vm31_vm4 = vmand %vm29_vm2, %vm30_vm3 }
   0xf   :  { %1605 = vmatprep.subr.bf16.mxu0 %v1824_v1  ;;  %v1920_v22 = vsel %vm31_vm4, 1.0, %v1827_v21  ;;  %v1922_v24 = vsel %vm31_vm4, 0.0, %v1827_v21 }
  0x10   :  { %1600 = vmatpush3.bf16.msra.mxu1 %v1887_v4 }
  0x11   :  { %1613 = vmatprep.subr.bf16.mxu1 %v1824_v1 }
  0xdc   :  { %v106_v9 = vpop.f32.mrb[0].mxu0 }
  0xdd   :  { %v1915_v10 = vadd.f32 %v1481_v7, %v106_v9  ;;  %v162_v11 = vpop.f32.mrb[0].mxu1  ;;  %v1579_v12 = vpop.f32.mrb[1].mxu0 }
  0xde   :  { %v1587_v13 = vpop.f32.mrb[1].mxu1  ;;  %v109_v14 = vpop.f32.mrb[2].mxu0 }
  0xdf   :  { %v168_v15 = vadd.f32 %v162_v11, %v1915_v10  ;;  %v1918_v16 = vadd.f32 %v1481_v7, %v109_v14  ;;  %v165_v17 = vpop.f32.mrb[2].mxu1  ;;  %v1580_v18 = vpop.f32.mrb[3].mxu0 }
  0xe0   :  { %v1588_v20 = vpop.f32.mrb[3].mxu1 }
  0xe1   :  { %1734 = vtanh.f32 %v168_v15 }
  0xeb   :  { %v1735_v23 = vpop.eup %1734 }
  0xec   :  { %v170_v25 = vmul.f32 %v1735_v23, %v1920_v22 }
  0xee   :  { %v171_v26 = vadd.f32 %v170_v25, %v1922_v24 }
  0xf0   :  { %174 = vrot.lane.b32.xlu0 %v171_v26, %s1828_s8  ;;  %v172_v29 = vmul.f32 0.0, %v171_v26 }
 0x162   :  { %v175_v27 = vpop.permute.xlu0 %174 }
 0x163   :  { %v177_v28 = vmul.f32 %v175_v27, %v171_v26 }
 0x165   :  { %179 = vrot.lane.b32.xlu0 %v177_v28, %s1829_s9 }
 0x1d7   :  { %v180_v30 = vpop.permute.xlu0 %179 }
 0x1d8   :  { %v182_v31 = vadd.f32 %v180_v30, %v172_v29 }
 0x1da   :  { %1736 = vtanh.f32 %v182_v31  ;;  %v244_v48 = vrot.slane %v182_v31, 6 }
 0x1e4   :  { %v1737_v32 = vpop.eup %1736 }
 0x1e5   :  { %185 = vrot.lane.b32.xlu1 %v1737_v32, %s1828_s8 }
 0x257   :  { %v186_v33 = vpop.permute.xlu1 %185 }
 0x258   :  { %v1929_v34 = vmul.f32 %v186_v33, %v171_v26 }
 0x25a   :  { %v189_v35 = vpack.c.bf16 %v1929_v34, %v1929_v34 }
 0x25c   :  { %191 = vrot.lane.b32.xlu1 %v189_v35, %s1829_s9 }
 0x2ce   :  { %v192_v36 = vpop.permute.xlu1 %191 }
 0x2cf   :  { %1594 = vmatmul.mubr.msk.bf16.vlgmr.msra.gmra.mrb[4].mxu0 %vm68_vm1, %v192_v36 }
 0x2d0   :  { %1606 = vmatpush3.bf16.msra.mxu0 %v1875_v2  ;;  %1609 = vmatprep.mubr.msk.bf16.mxu0 %vm1825_vm0, %v1824_v1 }
 0x2d1   :  { %1607 = vmatprep.subr.bf16.mxu0 %v1824_v1 }
 0x2d4   :  { %1608 = vmatpush3.bf16.msra.mxu0 %v1887_v4 }
 0x2d5   :  { %1621 = vmatprep.subr.bf16.mxu0 %v1824_v1 }
 0x3a2   :  { %v230_v37 = vpop.f32.mrb[4].mxu0 }
 0x3a3   :  { %v237_v38 = vrot.slane %v230_v37, 6  ;;  %v1595_v39 = vpop.f32.mrb[5].mxu0 }
 0x3a4   :  { %v233_v40 = vpop.f32.mrb[6].mxu0 }
 0x3a5   :  { %v239_v41 = vadd.f32 %v237_v38, %v1915_v10  ;;  %v1596_v42 = vpop.f32.mrb[7].mxu0 }
 0x3a7   :  { %1738 = vtanh.f32 %v239_v41 }
 0x3b1   :  { %v1739_v43 = vpop.eup %1738 }
 0x3b2   :  { %v241_v44 = vmul.f32 %v1739_v43, %v1920_v22 }
 0x3b4   :  { %v242_v45 = vadd.f32 %v241_v44, %v1922_v24 }
 0x3b6   :  { %248 = vrot.lane.b32.xlu0 %v242_v45, %s1828_s8  ;;  %v246_v49 = vmul.f32 %v244_v48, %v242_v45 }
 0x428   :  { %v249_v46 = vpop.permute.xlu0 %248 }
 0x429   :  { %v251_v47 = vmul.f32 %v249_v46, %v242_v45 }
 0x42b   :  { %253 = vrot.lane.b32.xlu1 %v251_v47, %s1829_s9 }
 0x49d   :  { %v254_v50 = vpop.permute.xlu1 %253 }
 0x49e   :  { %v256_v51 = vadd.f32 %v254_v50, %v246_v49 }
 0x4a0   :  { %1740 = vtanh.f32 %v256_v51  ;;  %v319_v9 = vrot.slane %v256_v51, 6 }
 0x4aa   :  { %v1741_v52 = vpop.eup %1740 }
 0x4ab   :  { %259 = vrot.lane.b32.xlu0 %v1741_v52, %s1828_s8 }
 0x51d   :  { %v260_v53 = vpop.permute.xlu0 %259 }
 0x51e   :  { %v262_v54 = vmul.f32 %v260_v53, %v242_v45 }
 0x520   :  { %v263_v55 = vpack.c.bf16 %v262_v54, %v262_v54  ;;  %v710_v18 = vsel %vm709_vm5, %v1929_v34, %v262_v54 }
 0x522   :  { %v265_v56 = vrot.slane %v263_v55, 1 }
 0x524   :  { %266 = vrot.lane.b32.xlu1 %v265_v56, %s1829_s9 }
 0x596   :  { %v267_v57 = vpop.permute.xlu1 %266 }
 0x597   :  { %1602 = vmatmul.mubr.msk.bf16.vlgmr.msra.gmra.mrb[4].mxu1 %vm68_vm1, %v267_v57 }
 0x598   :  { %1614 = vmatpush3.bf16.msra.mxu1 %v1875_v2  ;;  %1617 = vmatprep.mubr.msk.bf16.mxu1 %vm1825_vm0, %v1824_v1 }
 0x599   :  { %1615 = vmatprep.subr.bf16.mxu1 %v1824_v1 }
 0x59c   :  { %1616 = vmatpush3.bf16.msra.mxu1 %v1887_v4 }
 0x59d   :  { %1629 = vmatprep.subr.bf16.mxu1 %v1824_v1 }
 0x66a   :  { %v305_v58 = vpop.f32.mrb[4].mxu1 }
 0x66b   :  { %v312_v59 = vrot.slane %v305_v58, 4  ;;  %v1603_v60 = vpop.f32.mrb[5].mxu1 }
 0x66c   :  { %v308_v61 = vpop.f32.mrb[6].mxu1 }
 0x66d   :  { %v314_v62 = vadd.f32 %v312_v59, %v1915_v10  ;;  %v1604_v63 = vpop.f32.mrb[7].mxu1 }
 0x66f   :  { %1742 = vtanh.f32 %v314_v62 }
 0x679   :  { %v1743_v0 = vpop.eup %1742 }
 0x67a   :  { %v316_v3 = vmul.f32 %v1743_v0, %v1920_v22 }
 0x67c   :  { %v317_v5 = vadd.f32 %v316_v3, %v1922_v24 }
 0x67e   :  { %323 = vrot.lane.b32.xlu0 %v317_v5, %s1828_s8  ;;  %v321_v11 = vmul.f32 %v319_v9, %v317_v5 }
 0x6f0   :  { %v324_v7 = vpop.permute.xlu0 %323 }
 0x6f1   :  { %v326_v8 = vmul.f32 %v324_v7, %v317_v5 }
 0x6f3   :  { %328 = vrot.lane.b32.xlu1 %v326_v8, %s1829_s9 }
 0x765   :  { %v329_v12 = vpop.permute.xlu1 %328 }
 0x766   :  { %v331_v13 = vadd.f32 %v329_v12, %v321_v11 }
 0x768   :  { %1744 = vtanh.f32 %v331_v13  ;;  %v394_v36 = vrot.slane %v331_v13, 6 }
 0x772   :  { %v1745_v14 = vpop.eup %1744 }
 0x773   :  { %334 = vrot.lane.b32.xlu0 %v1745_v14, %s1828_s8 }
 0x7e5   :  { %v335_v15 = vpop.permute.xlu0 %334 }
 0x7e6   :  { %v337_v17 = vmul.f32 %v335_v15, %v317_v5 }
 0x7e8   :  { %v338_v19 = vpack.c.bf16 %v337_v17, %v337_v17  ;;  %v712_v20 = vsel %vm711_vm6, %v710_v18, %v337_v17 }
 0x7ea   :  { %v340_v21 = vrot.slane %v338_v19, 2 }
 0x7ec   :  { %341 = vrot.lane.b32.xlu1 %v340_v21, %s1829_s9 }
 0x85e   :  { %v342_v23 = vpop.permute.xlu1 %341 }
 0x85f   :  { %1610 = vmatmul.mubr.msk.bf16.vlgmr.msra.gmra.mrb[8].mxu0 %vm68_vm1, %v342_v23 }
 0x860   :  { %1622 = vmatpush3.bf16.msra.mxu0 %v1875_v2  ;;  %1625 = vmatprep.mubr.msk.bf16.mxu0 %vm1825_vm0, %v1824_v1 }
 0x861   :  { %1623 = vmatprep.subr.bf16.mxu0 %v1824_v1 }
 0x864   :  { %1624 = vmatpush3.bf16.msra.mxu0 %v1887_v4 }
 0x865   :  { %1637 = vmatprep.subr.bf16.mxu0 %v1824_v1 }
 0x932   :  { %v380_v25 = vpop.f32.mrb[8].mxu0 }
 0x933   :  { %v387_v26 = vrot.slane %v380_v25, 2  ;;  %v1611_v27 = vpop.f32.mrb[9].mxu0 }
 0x934   :  { %v383_v28 = vpop.f32.mrb[10].mxu0 }
 0x935   :  { %v389_v29 = vadd.f32 %v387_v26, %v1915_v10  ;;  %v1612_v30 = vpop.f32.mrb[11].mxu0 }
 0x937   :  { %1746 = vtanh.f32 %v389_v29 }
 0x941   :  { %v1747_v31 = vpop.eup %1746 }
 0x942   :  { %v391_v32 = vmul.f32 %v1747_v31, %v1920_v22 }
 0x944   :  { %v392_v33 = vadd.f32 %v391_v32, %v1922_v24 }
 0x946   :  { %398 = vrot.lane.b32.xlu0 %v392_v33, %s1828_s8  ;;  %v396_v37 = vmul.f32 %v394_v36, %v392_v33 }
 0x9b8   :  { %v399_v34 = vpop.permute.xlu0 %398 }
 0x9b9   :  { %v401_v35 = vmul.f32 %v399_v34, %v392_v33 }
 0x9bb   :  { %403 = vrot.lane.b32.xlu1 %v401_v35, %s1829_s9 }
 0xa2d   :  { %v404_v38 = vpop.permute.xlu1 %403 }
 0xa2e   :  { %v406_v39 = vadd.f32 %v404_v38, %v396_v37 }
 0xa30   :  { %1748 = vtanh.f32 %v406_v39  ;;  %v466_v56 = vrot.slane %v406_v39, 6 }
 0xa3a   :  { %v1749_v40 = vpop.eup %1748 }
 0xa3b   :  { %409 = vrot.lane.b32.xlu0 %v1749_v40, %s1828_s8 }
 0xaad   :  { %v410_v10 = vpop.permute.xlu0 %409 }
 0xaae   :  { %v412_v41 = vmul.f32 %v410_v10, %v392_v33 }
 0xab0   :  { %v413_v42 = vpack.c.bf16 %v412_v41, %v412_v41  ;;  %v1979_v43 = vsel %vm713_vm7, %v712_v20, %v412_v41 }
 0xab2   :  { %v415_v44 = vrot.slane %v413_v42, 3 }
 0xab4   :  { %416 = vrot.lane.b32.xlu1 %v415_v44, %s1829_s9 }
 0xb26   :  { %v417_v45 = vpop.permute.xlu1 %416 }
 0xb27   :  { %1618 = vmatmul.mubr.msk.bf16.vlgmr.msra.gmra.mrb[8].mxu1 %vm68_vm1, %v417_v45 }
 0xb28   :  { %1630 = vmatpush3.bf16.msra.mxu1 %v1875_v2  ;;  %1633 = vmatprep.mubr.msk.bf16.mxu1 %vm1825_vm0, %v1824_v1 }
 0xb29   :  { %1631 = vmatprep.subr.bf16.mxu1 %v1824_v1 }
 0xb2c   :  { %1632 = vmatpush3.bf16.msra.mxu1 %v1887_v4 }
 0xb2d   :  { %1645 = vmatprep.subr.bf16.mxu1 %v1824_v1 }
 0xbfa   :  { %v455_v46 = vpop.f32.mrb[8].mxu1 }
 0xbfb   :  { %v461_v47 = vadd.f32 %v455_v46, %v1918_v16  ;;  %v1619_v48 = vpop.f32.mrb[9].mxu1 }
 0xbfc   :  { %v458_v49 = vpop.f32.mrb[10].mxu1 }
 0xbfd   :  { %1750 = vtanh.f32 %v461_v47  ;;  %v1620_v50 = vpop.f32.mrb[11].mxu1 }
 0xc07   :  { %v1751_v51 = vpop.eup %1750 }
 0xc08   :  { %v463_v52 = vmul.f32 %v1751_v51, %v1920_v22 }
 0xc0a   :  { %v464_v53 = vadd.f32 %v463_v52, %v1922_v24 }
 0xc0c   :  { %470 = vrot.lane.b32.xlu0 %v464_v53, %s1828_s8  ;;  %v468_v57 = vmul.f32 %v466_v56, %v464_v53 }
 0xc7e   :  { %v471_v54 = vpop.permute.xlu0 %470 }
 0xc7f   :  { %v473_v55 = vmul.f32 %v471_v54, %v464_v53 }
 0xc81   :  { %475 = vrot.lane.b32.xlu1 %v473_v55, %s1829_s9 }
 0xcf3   :  { %v476_v58 = vpop.permute.xlu1 %475 }
 0xcf4   :  { %v478_v59 = vadd.f32 %v476_v58, %v468_v57 }
 0xcf6   :  { %1752 = vtanh.f32 %v478_v59 }
 0xd00   :  { %v1753_v60 = vpop.eup %1752 }
 0xd01   :  { %481 = vrot.lane.b32.xlu0 %v1753_v60, %s1828_s8 }
 0xd73   :  { %v482_v61 = vpop.permute.xlu0 %481 }
 0xd74   :  { %v1995_v62 = vmul.f32 %v482_v61, %v464_v53 }
 0xd76   :  { %v485_v63 = vpack.c.bf16 %v1995_v62, %v1995_v62 }
 0xd78   :  { %487 = vrot.lane.b32.xlu1 %v485_v63, %s1829_s9 }
 0xdea   :  { %v488_v0 = vpop.permute.xlu1 %487 }
 0xdeb   :  { %1626 = vmatmul.mubr.msk.bf16.vlgmr.msra.gmra.mrb[12].mxu0 %vm68_vm1, %v488_v0 }
 0xdec   :  { %1638 = vmatpush3.bf16.msra.mxu0 %v1875_v2  ;;  %1641 = vmatprep.mubr.msk.bf16.mxu0 %vm1825_vm0, %v1824_v1 }
 0xded   :  { %1639 = vmatprep.subr.bf16.mxu0 %v1824_v1 }
 0xdf0   :  { %1640 = vmatpush3.bf16.msra.mxu0 %v1887_v4  ;;  %v540_v4 = vrot.slane %v478_v59, 6 }
 0xdf1   :  { %1653 = vmatprep.subr.bf16.mxu0 %v1824_v1 }
 0xebe   :  { %v526_v3 = vpop.f32.mrb[12].mxu0 }
 0xebf   :  { %v533_v5 = vrot.slane %v526_v3, 6  ;;  %v1627_v7 = vpop.f32.mrb[13].mxu0 }
 0xec0   :  { %v529_v8 = vpop.f32.mrb[14].mxu0  ;;  %v1732_v7 = vld [vmem:[%s2211_s1 + $0x18] sm:$0xff]  }
 0xec1   :  { %v535_v9 = vadd.f32 %v533_v5, %v1918_v16  ;;  %v1628_v11 = vpop.f32.mrb[15].mxu0  ;;  %v2044_v5 = vld [vmem:[%s2212_s2 + $0x10] sm:$0xff]   ;;  %v2053_v8 = vld [vmem:[%s2212_s2 + $0x18] sm:$0xff]  }
 0xec3   :  { %1754 = vtanh.f32 %v535_v9 }
 0xecd   :  { %v1755_v12 = vpop.eup %1754 }
 0xece   :  { %v537_v2 = vmul.f32 %v1755_v12, %v1920_v22 }
 0xed0   :  { %v538_v13 = vadd.f32 %v537_v2, %v1922_v24 }
 0xed2   :  { %544 = vrot.lane.b32.xlu0 %v538_v13, %s1828_s8  ;;  %v542_v17 = vmul.f32 %v540_v4, %v538_v13 }
 0xf44   :  { %v545_v14 = vpop.permute.xlu0 %544 }
 0xf45   :  { %v547_v15 = vmul.f32 %v545_v14, %v538_v13 }
 0xf47   :  { %549 = vrot.lane.b32.xlu1 %v547_v15, %s1829_s9 }
 0xfb9   :  { %v550_v18 = vpop.permute.xlu1 %549 }
 0xfba   :  { %v552_v19 = vadd.f32 %v550_v18, %v542_v17 }
 0xfbc   :  { %1756 = vtanh.f32 %v552_v19  ;;  %v615_v39 = vrot.slane %v552_v19, 6 }
 0xfc6   :  { %v1757_v20 = vpop.eup %1756 }
 0xfc7   :  { %555 = vrot.lane.b32.xlu0 %v1757_v20, %s1828_s8 }
0x1039   :  { %v556_v21 = vpop.permute.xlu0 %555 }
0x103a   :  { %v558_v23 = vmul.f32 %v556_v21, %v538_v13 }
0x103c   :  { %v559_v25 = vpack.c.bf16 %v558_v23, %v558_v23  ;;  %v715_v46 = vsel %vm709_vm5, %v1995_v62, %v558_v23 }
0x103e   :  { %v561_v26 = vrot.slane %v559_v25, 1 }
0x1040   :  { %562 = vrot.lane.b32.xlu1 %v561_v26, %s1829_s9 }
0x10b2   :  { %v563_v27 = vpop.permute.xlu1 %562 }
0x10b3   :  { %1634 = vmatmul.mubr.msk.bf16.vlgmr.msra.gmra.mrb[12].mxu1 %vm68_vm1, %v563_v27 }
0x10b4   :  { %1649 = vmatprep.mubr.msk.bf16.mxu1 %vm1825_vm0, %v1824_v1 }
0x1186   :  { %v601_v28 = vpop.f32.mrb[12].mxu1 }
0x1187   :  { %v608_v29 = vrot.slane %v601_v28, 4  ;;  %v1635_v30 = vpop.f32.mrb[13].mxu1 }
0x1188   :  { %v604_v31 = vpop.f32.mrb[14].mxu1 }
0x1189   :  { %v610_v32 = vadd.f32 %v608_v29, %v1918_v16  ;;  %v1636_v33 = vpop.f32.mrb[15].mxu1 }
0x118b   :  { %1758 = vtanh.f32 %v610_v32 }
0x1195   :  { %v1759_v34 = vpop.eup %1758 }
0x1196   :  { %v612_v35 = vmul.f32 %v1759_v34, %v1920_v22 }
0x1198   :  { %v613_v36 = vadd.f32 %v612_v35, %v1922_v24 }
0x119a   :  { %619 = vrot.lane.b32.xlu0 %v613_v36, %s1828_s8  ;;  %v617_v40 = vmul.f32 %v615_v39, %v613_v36 }
0x120c   :  { %v620_v37 = vpop.permute.xlu0 %619 }
0x120d   :  { %v622_v38 = vmul.f32 %v620_v37, %v613_v36 }
0x120f   :  { %624 = vrot.lane.b32.xlu1 %v622_v38, %s1829_s9 }
0x1281   :  { %v625_v10 = vpop.permute.xlu1 %624 }
0x1282   :  { %v627_v41 = vadd.f32 %v625_v10, %v617_v40 }
0x1284   :  { %1760 = vtanh.f32 %v627_v41  ;;  %v690_v62 = vrot.slane %v627_v41, 6 }
0x128e   :  { %v1761_v42 = vpop.eup %1760 }
0x128f   :  { %630 = vrot.lane.b32.xlu0 %v1761_v42, %s1828_s8 }
0x1301   :  { %v631_v44 = vpop.permute.xlu0 %630 }
0x1302   :  { %v633_v45 = vmul.f32 %v631_v44, %v613_v36 }
0x1304   :  { %v634_v47 = vpack.c.bf16 %v633_v45, %v633_v45  ;;  %v716_v48 = vsel %vm711_vm6, %v715_v46, %v633_v45 }
0x1306   :  { %v636_v49 = vrot.slane %v634_v47, 2 }
0x1308   :  { %637 = vrot.lane.b32.xlu1 %v636_v49, %s1829_s9 }
0x137a   :  { %v638_v50 = vpop.permute.xlu1 %637 }
0x137b   :  { %1642 = vmatmul.mubr.msk.bf16.vlgmr.msra.gmra.mrb[16].mxu0 %vm68_vm1, %v638_v50 }
0x137c   :  { %1657 = vmatprep.mubr.msk.bf16.mxu0 %vm1825_vm0, %v1824_v1  ;;  %1654 = vmatpush3.bf16.msra.mxu0 %v2044_v5 }
0x137d   :  { %1655 = vmatprep.subr.bf16.mxu0 %v1824_v1 }
0x1380   :  { %1656 = vmatpush3.bf16.msra.mxu0 %v2053_v8 }
0x1381   :  { %1669 = vmatprep.subr.bf16.mxu0 %v1824_v1 }
0x1383   :  { %1658 = vmatmul.mubr.bf16.vlgmr.msra.gmra.mrb[20].mxu0 %v1826_v6 }
0x1384   :  { %1670 = vmatpush3.bf16.msra.mxu0 %v2044_v5  ;;  %1673 = vmatprep.mubr.msk.bf16.mxu0 %vm1825_vm0, %v1824_v1 }
0x1385   :  { %1671 = vmatprep.subr.bf16.mxu0 %v1824_v1 }
0x1388   :  { %1672 = vmatpush3.bf16.msra.mxu0 %v2053_v8 }
0x1389   :  { %1685 = vmatprep.subr.bf16.mxu0 %v1824_v1 }
0x144e   :  { %v676_v51 = vpop.f32.mrb[16].mxu0 }
0x144f   :  { %v683_v52 = vrot.slane %v676_v51, 2  ;;  %v1643_v53 = vpop.f32.mrb[17].mxu0 }
0x1450   :  { %v679_v54 = vpop.f32.mrb[18].mxu0 }
0x1451   :  { %v685_v55 = vadd.f32 %v683_v52, %v1918_v16  ;;  %v1644_v56 = vpop.f32.mrb[19].mxu0  ;;  %v1730_v16 = vld [vmem:[%s2211_s1 + $0x10] sm:$0xff]  }
0x1452   :  { %1646 = vmatpush3.bf16.msra.mxu1 %v1730_v16 }
0x1453   :  { %1762 = vtanh.f32 %v685_v55  ;;  %1647 = vmatprep.subr.bf16.mxu1 %v1824_v1 }
0x1456   :  { %1648 = vmatpush3.bf16.msra.mxu1 %v1732_v7  ;;  %v842_v6 = vpop.f32.mrb[20].mxu0 }
0x1457   :  { %1661 = vmatprep.subr.bf16.mxu1 %v1824_v1  ;;  %v1659_v14 = vpop.f32.mrb[21].mxu0 }
0x1458   :  { %v845_v15 = vpop.f32.mrb[22].mxu0 }
0x1459   :  { %v1660_v4 = vpop.f32.mrb[23].mxu0 }
0x145d   :  { %v1763_v57 = vpop.eup %1762 }
0x145e   :  { %v687_v58 = vmul.f32 %v1763_v57, %v1920_v22 }
0x1460   :  { %v688_v59 = vadd.f32 %v687_v58, %v1922_v24 }
0x1462   :  { %694 = vrot.lane.b32.xlu0 %v688_v59, %s1828_s8  ;;  %v692_v63 = vmul.f32 %v690_v62, %v688_v59 }
0x14d4   :  { %v695_v60 = vpop.permute.xlu0 %694 }
0x14d5   :  { %v697_v61 = vmul.f32 %v695_v60, %v688_v59 }
0x14d7   :  { %699 = vrot.lane.b32.xlu1 %v697_v61, %s1829_s9 }
0x1549   :  { %v700_v0 = vpop.permute.xlu1 %699 }
0x154a   :  { %v2035_v3 = vadd.f32 %v700_v0, %v692_v63 }
0x154c   :  { %1764 = vtanh.f32 %v2035_v3 }
0x1556   :  { %v1765_v9 = vpop.eup %1764 }
0x1557   :  { %705 = vrot.lane.b32.xlu0 %v1765_v9, %s1828_s8 }
0x15c9   :  { %v706_v11 = vpop.permute.xlu0 %705 }
0x15ca   :  { %v2068_v12 = vmul.f32 %v706_v11, %v688_v59 }
0x15cc   :  { %v717_v2 = vsel %vm713_vm7, %v716_v48, %v2068_v12 }
0x15cd   :  { %v730_v13 = vpack.c.bf16 %v717_v2, %v1979_v43  ;;  %v1504_v43 = vld [vmem:[%s2213_s3 + $0x1] ss:$0 sm:$0xff] }
0x15cf   :  { %738 = vrot.lane.b32.xlu1 %v730_v13, %s1829_s9 }
0x1641   :  { %v739_v17 = vpop.permute.xlu1 %738 }
0x1642   :  { %1650 = vmatmul.mubr.msk.bf16.vlgmr.msra.gmra.mrb[16].mxu1 %vm68_vm1, %v739_v17 }
0x1643   :  { %1662 = vmatpush3.bf16.msra.mxu1 %v2044_v5  ;;  %1665 = vmatprep.mubr.msk.bf16.mxu1 %vm1825_vm0, %v1824_v1 }
0x1644   :  { %1663 = vmatprep.subr.bf16.mxu1 %v1824_v1 }
0x1647   :  { %1664 = vmatpush3.bf16.msra.mxu1 %v2053_v8 }
0x1648   :  { %1677 = vmatprep.subr.bf16.mxu1 %v1824_v1 }
0x1715   :  { %v789_v18 = vpop.f32.mrb[16].mxu1 }
0x1716   :  { %v2084_v19 = vadd.f32 %v1504_v43, %v789_v18  ;;  %v1651_v20 = vpop.f32.mrb[17].mxu1 }
0x1717   :  { %v792_v21 = vpop.f32.mrb[18].mxu1 }
0x1718   :  { %v848_v23 = vadd.f32 %v842_v6, %v2084_v19  ;;  %v2087_v25 = vadd.f32 %v1504_v43, %v792_v21  ;;  %v1652_v26 = vpop.f32.mrb[19].mxu1 }
0x171a   :  { %1766 = vtanh.f32 %v848_v23 }
0x1724   :  { %v1767_v27 = vpop.eup %1766 }
0x1725   :  { %v850_v28 = vmul.f32 %v1767_v27, %v1920_v22 }
0x1727   :  { %v851_v29 = vadd.f32 %v850_v28, %v1922_v24 }
0x1729   :  { %854 = vrot.lane.b32.xlu0 %v851_v29, %s1828_s8  ;;  %v852_v32 = vmul.f32 0.0, %v851_v29 }
0x179b   :  { %v855_v30 = vpop.permute.xlu0 %854 }
0x179c   :  { %v857_v31 = vmul.f32 %v855_v30, %v851_v29 }
0x179e   :  { %859 = vrot.lane.b32.xlu1 %v857_v31, %s1829_s9 }
0x1810   :  { %v860_v33 = vpop.permute.xlu1 %859 }
0x1811   :  { %v862_v34 = vadd.f32 %v860_v33, %v852_v32 }
0x1813   :  { %1768 = vtanh.f32 %v862_v34  ;;  %v924_v51 = vrot.slane %v862_v34, 6 }
0x181d   :  { %v1769_v35 = vpop.eup %1768 }
0x181e   :  { %865 = vrot.lane.b32.xlu0 %v1769_v35, %s1828_s8 }
0x1890   :  { %v866_v36 = vpop.permute.xlu0 %865 }
0x1891   :  { %v868_v37 = vmul.f32 %v866_v36, %v851_v29 }
0x1893   :  { %v869_v38 = vpack.c.bf16 %v868_v37, %v868_v37 }
0x1895   :  { %871 = vrot.lane.b32.xlu1 %v869_v38, %s1829_s9 }
0x1907   :  { %v872_v39 = vpop.permute.xlu1 %871 }
0x1908   :  { %1666 = vmatmul.mubr.msk.bf16.vlgmr.msra.gmra.mrb[20].mxu1 %vm68_vm1, %v872_v39 }
0x1909   :  { %1678 = vmatpush3.bf16.msra.mxu1 %v2044_v5  ;;  %1681 = vmatprep.mubr.msk.bf16.mxu1 %vm1825_vm0, %v1824_v1 }
0x190a   :  { %1679 = vmatprep.subr.bf16.mxu1 %v1824_v1 }
0x190d   :  { %1680 = vmatpush3.bf16.msra.mxu1 %v2053_v8 }
0x190e   :  { %1693 = vmatprep.subr.bf16.mxu1 %v1824_v1 }
0x19db   :  { %v910_v40 = vpop.f32.mrb[20].mxu1 }
0x19dc   :  { %v917_v10 = vrot.slane %v910_v40, 6  ;;  %v1667_v41 = vpop.f32.mrb[21].mxu1 }
0x19dd   :  { %v913_v42 = vpop.f32.mrb[22].mxu1 }
0x19de   :  { %v919_v44 = vadd.f32 %v917_v10, %v2084_v19  ;;  %v1668_v45 = vpop.f32.mrb[23].mxu1 }
0x19e0   :  { %1770 = vtanh.f32 %v919_v44 }
0x19ea   :  { %v1771_v46 = vpop.eup %1770 }
0x19eb   :  { %v921_v47 = vmul.f32 %v1771_v46, %v1920_v22 }
0x19ed   :  { %v922_v48 = vadd.f32 %v921_v47, %v1922_v24 }
0x19ef   :  { %928 = vrot.lane.b32.xlu0 %v922_v48, %s1828_s8  ;;  %v926_v52 = vmul.f32 %v924_v51, %v922_v48 }
0x1a61   :  { %v929_v49 = vpop.permute.xlu0 %928 }
0x1a62   :  { %v931_v50 = vmul.f32 %v929_v49, %v922_v48 }
0x1a64   :  { %933 = vrot.lane.b32.xlu1 %v931_v50, %s1829_s9 }
0x1ad6   :  { %v934_v53 = vpop.permute.xlu1 %933 }
0x1ad7   :  { %v936_v54 = vadd.f32 %v934_v53, %v926_v52 }
0x1ad9   :  { %1772 = vtanh.f32 %v936_v54  ;;  %v999_v14 = vrot.slane %v936_v54, 6 }
0x1ae3   :  { %v1773_v55 = vpop.eup %1772 }
0x1ae4   :  { %939 = vrot.lane.b32.xlu0 %v1773_v55, %s1828_s8 }
0x1b56   :  { %v940_v56 = vpop.permute.xlu0 %939 }
0x1b57   :  { %v942_v57 = vmul.f32 %v940_v56, %v922_v48 }
0x1b59   :  { %v943_v58 = vpack.c.bf16 %v942_v57, %v942_v57 }
0x1b5b   :  { %v945_v59 = vrot.slane %v943_v58, 1 }
0x1b5d   :  { %946 = vrot.lane.b32.xlu1 %v945_v59, %s1829_s9 }
0x1bcf   :  { %v947_v60 = vpop.permute.xlu1 %946 }
0x1bd0   :  { %1674 = vmatmul.mubr.msk.bf16.vlgmr.msra.gmra.mrb[24].mxu0 %vm68_vm1, %v947_v60 }
0x1bd1   :  { %1686 = vmatpush3.bf16.msra.mxu0 %v2044_v5  ;;  %1689 = vmatprep.mubr.msk.bf16.mxu0 %vm1825_vm0, %v1824_v1 }
0x1bd2   :  { %1687 = vmatprep.subr.bf16.mxu0 %v1824_v1 }
0x1bd5   :  { %1688 = vmatpush3.bf16.msra.mxu0 %v2053_v8 }
0x1bd6   :  { %1701 = vmatprep.subr.bf16.mxu0 %v1824_v1 }
0x1ca3   :  { %v985_v61 = vpop.f32.mrb[24].mxu0 }
0x1ca4   :  { %v992_v62 = vrot.slane %v985_v61, 4  ;;  %v1675_v63 = vpop.f32.mrb[25].mxu0 }
0x1ca5   :  { %v988_v0 = vpop.f32.mrb[26].mxu0 }
0x1ca6   :  { %v994_v16 = vadd.f32 %v992_v62, %v2084_v19  ;;  %v1676_v7 = vpop.f32.mrb[27].mxu0 }
0x1ca8   :  { %1774 = vtanh.f32 %v994_v16 }
0x1cb2   :  { %v1775_v9 = vpop.eup %1774 }
0x1cb3   :  { %v996_v11 = vmul.f32 %v1775_v9, %v1920_v22 }
0x1cb5   :  { %v997_v2 = vadd.f32 %v996_v11, %v1922_v24 }
0x1cb7   :  { %1003 = vrot.lane.b32.xlu0 %v997_v2, %s1828_s8  ;;  %v1001_v15 = vmul.f32 %v999_v14, %v997_v2 }
0x1d29   :  { %v1004_v13 = vpop.permute.xlu0 %1003 }
0x1d2a   :  { %v1006_v6 = vmul.f32 %v1004_v13, %v997_v2 }
0x1d2c   :  { %1008 = vrot.lane.b32.xlu1 %v1006_v6, %s1829_s9 }
0x1d9e   :  { %v1009_v4 = vpop.permute.xlu1 %1008 }
0x1d9f   :  { %v1011_v17 = vadd.f32 %v1009_v4, %v1001_v15 }
0x1da1   :  { %1776 = vtanh.f32 %v1011_v17  ;;  %v1074_v38 = vrot.slane %v1011_v17, 6 }
0x1dab   :  { %v1777_v43 = vpop.eup %1776 }
0x1dac   :  { %1014 = vrot.lane.b32.xlu0 %v1777_v43, %s1828_s8 }
0x1e1e   :  { %v1015_v18 = vpop.permute.xlu0 %1014 }
0x1e1f   :  { %v1017_v20 = vmul.f32 %v1015_v18, %v997_v2 }
0x1e21   :  { %v1018_v21 = vpack.c.bf16 %v1017_v20, %v1017_v20 }
0x1e23   :  { %v1020_v23 = vrot.slane %v1018_v21, 2 }
0x1e25   :  { %1021 = vrot.lane.b32.xlu1 %v1020_v23, %s1829_s9 }
0x1e97   :  { %v1022_v26 = vpop.permute.xlu1 %1021 }
0x1e98   :  { %1682 = vmatmul.mubr.msk.bf16.vlgmr.msra.gmra.mrb[24].mxu1 %vm68_vm1, %v1022_v26 }
0x1e99   :  { %1694 = vmatpush3.bf16.msra.mxu1 %v2044_v5  ;;  %1697 = vmatprep.mubr.msk.bf16.mxu1 %vm1825_vm0, %v1824_v1 }
0x1e9a   :  { %1695 = vmatprep.subr.bf16.mxu1 %v1824_v1 }
0x1e9d   :  { %1696 = vmatpush3.bf16.msra.mxu1 %v2053_v8 }
0x1e9e   :  { %1709 = vmatprep.subr.bf16.mxu1 %v1824_v1 }
0x1f6b   :  { %v1060_v27 = vpop.f32.mrb[24].mxu1 }
0x1f6c   :  { %v1067_v28 = vrot.slane %v1060_v27, 2  ;;  %v1683_v29 = vpop.f32.mrb[25].mxu1 }
0x1f6d   :  { %v1063_v30 = vpop.f32.mrb[26].mxu1 }
0x1f6e   :  { %v1069_v31 = vadd.f32 %v1067_v28, %v2084_v19  ;;  %v1684_v32 = vpop.f32.mrb[27].mxu1 }
0x1f70   :  { %1778 = vtanh.f32 %v1069_v31 }
0x1f7a   :  { %v1779_v33 = vpop.eup %1778 }
0x1f7b   :  { %v1071_v34 = vmul.f32 %v1779_v33, %v1920_v22 }
0x1f7d   :  { %v1072_v35 = vadd.f32 %v1071_v34, %v1922_v24 }
0x1f7f   :  { %1078 = vrot.lane.b32.xlu0 %v1072_v35, %s1828_s8  ;;  %v1076_v39 = vmul.f32 %v1074_v38, %v1072_v35 }
0x1ff1   :  { %v1079_v36 = vpop.permute.xlu0 %1078 }
0x1ff2   :  { %v1081_v37 = vmul.f32 %v1079_v36, %v1072_v35 }
0x1ff4   :  { %1083 = vrot.lane.b32.xlu1 %v1081_v37, %s1829_s9 }
0x2066   :  { %v1084_v40 = vpop.permute.xlu1 %1083 }
0x2067   :  { %v1086_v10 = vadd.f32 %v1084_v40, %v1076_v39 }
0x2069   :  { %1780 = vtanh.f32 %v1086_v10  ;;  %v1146_v57 = vrot.slane %v1086_v10, 6 }
0x2073   :  { %v1781_v41 = vpop.eup %1780 }
0x2074   :  { %1089 = vrot.lane.b32.xlu0 %v1781_v41, %s1828_s8 }
0x20e6   :  { %v1090_v19 = vpop.permute.xlu0 %1089 }
0x20e7   :  { %v1092_v42 = vmul.f32 %v1090_v19, %v1072_v35 }
0x20e9   :  { %v1093_v44 = vpack.c.bf16 %v1092_v42, %v1092_v42 }
0x20eb   :  { %v1095_v45 = vrot.slane %v1093_v44, 3 }
0x20ed   :  { %1096 = vrot.lane.b32.xlu1 %v1095_v45, %s1829_s9 }
0x215f   :  { %v1097_v46 = vpop.permute.xlu1 %1096 }
0x2160   :  { %1690 = vmatmul.mubr.msk.bf16.vlgmr.msra.gmra.mrb[28].mxu0 %vm68_vm1, %v1097_v46 }
0x2161   :  { %1702 = vmatpush3.bf16.msra.mxu0 %v2044_v5  ;;  %1705 = vmatprep.mubr.msk.bf16.mxu0 %vm1825_vm0, %v1824_v1 }
0x2162   :  { %1703 = vmatprep.subr.bf16.mxu0 %v1824_v1 }
0x2165   :  { %1704 = vmatpush3.bf16.msra.mxu0 %v2053_v8 }
0x2233   :  { %v1135_v47 = vpop.f32.mrb[28].mxu0 }
0x2234   :  { %v1141_v48 = vadd.f32 %v1135_v47, %v2087_v25  ;;  %v1691_v49 = vpop.f32.mrb[29].mxu0 }
0x2235   :  { %v1138_v50 = vpop.f32.mrb[30].mxu0 }
0x2236   :  { %1782 = vtanh.f32 %v1141_v48  ;;  %v1692_v51 = vpop.f32.mrb[31].mxu0 }
0x2240   :  { %v1783_v52 = vpop.eup %1782 }
0x2241   :  { %v1143_v53 = vmul.f32 %v1783_v52, %v1920_v22 }
0x2243   :  { %v1144_v54 = vadd.f32 %v1143_v53, %v1922_v24 }
0x2245   :  { %1150 = vrot.lane.b32.xlu0 %v1144_v54, %s1828_s8  ;;  %v1148_v58 = vmul.f32 %v1146_v57, %v1144_v54 }
0x22b7   :  { %v1151_v55 = vpop.permute.xlu0 %1150 }
0x22b8   :  { %v1153_v56 = vmul.f32 %v1151_v55, %v1144_v54 }
0x22ba   :  { %1155 = vrot.lane.b32.xlu1 %v1153_v56, %s1829_s9 }
0x232c   :  { %v1156_v59 = vpop.permute.xlu1 %1155 }
0x232d   :  { %v1158_v60 = vadd.f32 %v1156_v59, %v1148_v58 }
0x232f   :  { %1784 = vtanh.f32 %v1158_v60 }
0x2339   :  { %v1785_v61 = vpop.eup %1784 }
0x233a   :  { %1161 = vrot.lane.b32.xlu0 %v1785_v61, %s1828_s8 }
0x23ac   :  { %v1162_v62 = vpop.permute.xlu0 %1161 }
0x23ad   :  { %v1164_v63 = vmul.f32 %v1162_v62, %v1144_v54 }
0x23af   :  { %v1165_v0 = vpack.c.bf16 %v1164_v63, %v1164_v63 }
0x23b1   :  { %1167 = vrot.lane.b32.xlu1 %v1165_v0, %s1829_s9 }
0x2423   :  { %v1168_v16 = vpop.permute.xlu1 %1167 }
0x2424   :  { %1698 = vmatmul.mubr.msk.bf16.vlgmr.msra.gmra.mrb[28].mxu1 %vm68_vm1, %v1168_v16  ;;  %v1390_v16 = vrot.slane %v2068_v12, 6 }
0x2425   :  { %1710 = vmatpush3.bf16.msra.mxu1 %v2044_v5  ;;  %1713 = vmatprep.mubr.msk.bf16.mxu1 %vm1825_vm0, %v1824_v1 }
0x2426   :  { %1711 = vmatprep.subr.bf16.mxu1 %v1824_v1  ;;  %v1220_v1 = vrot.slane %v1158_v60, 6  ;;  %v1396_v60 = vrot.slane %v2035_v3, 2 }
0x2429   :  { %1712 = vmatpush3.bf16.msra.mxu1 %v2053_v8 }
0x24f7   :  { %v1206_v7 = vpop.f32.mrb[28].mxu1 }
0x24f8   :  { %v1213_v9 = vrot.slane %v1206_v7, 6  ;;  %v1699_v11 = vpop.f32.mrb[29].mxu1 }
0x24f9   :  { %v1209_v2 = vpop.f32.mrb[30].mxu1 }
0x24fa   :  { %v1215_v13 = vadd.f32 %v1213_v9, %v2087_v25  ;;  %v1700_v6 = vpop.f32.mrb[31].mxu1 }
0x24fc   :  { %1786 = vtanh.f32 %v1215_v13 }
0x2506   :  { %v1787_v14 = vpop.eup %1786 }
0x2507   :  { %v1217_v15 = vmul.f32 %v1787_v14, %v1920_v22 }
0x2509   :  { %v1218_v5 = vadd.f32 %v1217_v15, %v1922_v24  ;;  %v1517_v15 = vld [vmem:[%s2214_s4] ss:$0 sm:$0xff]  ;;  %s1831_s4 = smov [#allocation2]  }
0x250b   :  { %1224 = vrot.lane.b32.xlu0 %v1218_v5, %s1828_s8  ;;  %v1222_v8 = vmul.f32 %v1220_v1, %v1218_v5 }
0x257d   :  { %v1225_v4 = vpop.permute.xlu0 %1224 }
0x257e   :  { %v1227_v17 = vmul.f32 %v1225_v4, %v1218_v5 }
0x2580   :  { %1229 = vrot.lane.b32.xlu1 %v1227_v17, %s1829_s9 }
0x25f2   :  { %v1230_v43 = vpop.permute.xlu1 %1229 }
0x25f3   :  { %v1232_v18 = vadd.f32 %v1230_v43, %v1222_v8  ;;  %v1518_v43 = vld [vmem:[%s2215_s5] ss:$0 sm:$0xff]  ;;  %s1473_s5 = sshll.u32 %s1831_s4, 4  ;;  %s1474_s5 = int_to_ptr.vmem [resolvable:$true] %s1473_s5 }
0x25f4   :  { %s1800_s22 = scalar_lea.vmem %s1474_s5, 32  ;;  %p1805_p1 = scmp.lt.s32.totalorder %s1474_s5, %s1474_s5 }
0x25f5   :  { %1788 = vtanh.f32 %v1232_v18  ;;  %v1295_v40 = vrot.slane %v1232_v18, 6  ;;  %p1801_p0 = scmp.ne.s32.totalorder %s1474_s5, %s1800_s22  ;;  %p1806_p2 = scmp.lt.s32.totalorder %s1800_s22, %s1800_s22 }
0x25f7   :  { %p1807_p3 = por %p1806_p2, %p1805_p1 }
0x25f9   :  { %p1808_p4 = pnand %p1807_p3, %p1801_p0 }
0x25ff   :  { %v1789_v20 = vpop.eup %1788 }
0x2600   :  { %1235 = vrot.lane.b32.xlu0 %v1789_v20, %s1828_s8 }
0x2672   :  { %v1236_v21 = vpop.permute.xlu0 %1235 }
0x2673   :  { %v1238_v23 = vmul.f32 %v1236_v21, %v1218_v5 }
0x2675   :  { %v1239_v26 = vpack.c.bf16 %v1238_v23, %v1238_v23 }
0x2677   :  { %v1241_v27 = vrot.slane %v1239_v26, 1 }
0x2679   :  { %1242 = vrot.lane.b32.xlu1 %v1241_v27, %s1829_s9 }
0x26eb   :  { %v1243_v28 = vpop.permute.xlu1 %1242 }
0x26ec   :  { %1706 = vmatmul.mubr.msk.bf16.vlgmr.msra.gmra.mrb[32].mxu0 %vm68_vm1, %v1243_v28 }
0x27bf   :  { %v1281_v29 = vpop.f32.mrb[32].mxu0 }
0x27c0   :  { %v1288_v30 = vrot.slane %v1281_v29, 4  ;;  %v1707_v31 = vpop.f32.mrb[33].mxu0 }
0x27c1   :  { %v1284_v32 = vpop.f32.mrb[34].mxu0 }
0x27c2   :  { %v1290_v33 = vadd.f32 %v1288_v30, %v2087_v25  ;;  %v1708_v34 = vpop.f32.mrb[35].mxu0 }
0x27c4   :  { %1790 = vtanh.f32 %v1290_v33 }
0x27ce   :  { %v1791_v35 = vpop.eup %1790 }
0x27cf   :  { %v1292_v36 = vmul.f32 %v1791_v35, %v1920_v22 }
0x27d1   :  { %v1293_v37 = vadd.f32 %v1292_v36, %v1922_v24 }
0x27d3   :  { %1299 = vrot.lane.b32.xlu0 %v1293_v37, %s1828_s8  ;;  %v1297_v10 = vmul.f32 %v1295_v40, %v1293_v37 }
0x2845   :  { %v1300_v38 = vpop.permute.xlu0 %1299 }
0x2846   :  { %v1302_v39 = vmul.f32 %v1300_v38, %v1293_v37 }
0x2848   :  { %1304 = vrot.lane.b32.xlu1 %v1302_v39, %s1829_s9 }
0x28ba   :  { %v1305_v41 = vpop.permute.xlu1 %1304 }
0x28bb   :  { %v1307_v19 = vadd.f32 %v1305_v41, %v1297_v10 }
0x28bd   :  { %1792 = vtanh.f32 %v1307_v19  ;;  %v1370_v61 = vrot.slane %v1307_v19, 6 }
0x28c7   :  { %v1793_v42 = vpop.eup %1792 }
0x28c8   :  { %1310 = vrot.lane.b32.xlu0 %v1793_v42, %s1828_s8 }
0x293a   :  { %v1311_v44 = vpop.permute.xlu0 %1310 }
0x293b   :  { %v1313_v45 = vmul.f32 %v1311_v44, %v1293_v37 }
0x293d   :  { %v1314_v46 = vpack.c.bf16 %v1313_v45, %v1313_v45 }
0x293f   :  { %v1316_v47 = vrot.slane %v1314_v46, 2 }
0x2941   :  { %1317 = vrot.lane.b32.xlu1 %v1316_v47, %s1829_s9 }
0x29b3   :  { %v1318_v48 = vpop.permute.xlu1 %1317 }
0x29b4   :  { %1714 = vmatmul.mubr.msk.bf16.vlgmr.msra.gmra.mrb[32].mxu1 %vm68_vm1, %v1318_v48 }
0x2a87   :  { %v1356_v49 = vpop.f32.mrb[32].mxu1 }
0x2a88   :  { %v1363_v50 = vrot.slane %v1356_v49, 2  ;;  %v1715_v51 = vpop.f32.mrb[33].mxu1 }
0x2a89   :  { %v1359_v52 = vpop.f32.mrb[34].mxu1 }
0x2a8a   :  { %v1365_v53 = vadd.f32 %v1363_v50, %v2087_v25  ;;  %v1716_v54 = vpop.f32.mrb[35].mxu1 }
0x2a8c   :  { %1794 = vtanh.f32 %v1365_v53 }
0x2a96   :  { %v1795_v55 = vpop.eup %1794 }
0x2a97   :  { %v1367_v56 = vmul.f32 %v1795_v55, %v1920_v22 }
0x2a99   :  { %v1368_v57 = vadd.f32 %v1367_v56, %v1922_v24 }
0x2a9b   :  { %1374 = vrot.lane.b32.xlu0 %v1368_v57, %s1828_s8  ;;  %v1372_v62 = vmul.f32 %v1370_v61, %v1368_v57 }
0x2b0d   :  { %v1375_v58 = vpop.permute.xlu0 %1374 }
0x2b0e   :  { %v1377_v59 = vmul.f32 %v1375_v58, %v1368_v57 }
0x2b10   :  { %1379 = vrot.lane.b32.xlu1 %v1377_v59, %s1829_s9 }
0x2b14   :  { %1397 = vrot.lane.b32.xlu1 %v1396_v60, %s1828_s8 }
0x2b82   :  { %v1380_v25 = vpop.permute.xlu1 %1379 }
0x2b83   :  { %v1382_v63 = vadd.f32 %v1380_v25, %v1372_v62 }
0x2b85   :  { %1796 = vtanh.f32 %v1382_v63 }
0x2b86   :  { %v1398_v9 = vpop.permute.xlu1 %1397 }
0x2b8f   :  { %v1797_v0 = vpop.eup %1796 }
0x2b90   :  { %1385 = vrot.lane.b32.xlu0 %v1797_v0, %s1828_s8 }
0x2b94   :  { %1401 = vrot.lane.b32.xlu0 %v1382_v63, %s1828_s8 }
0x2c02   :  { %v1386_v22 = vpop.permute.xlu0 %1385 }
0x2c03   :  { %v1388_v24 = vmul.f32 %v1386_v22, %v1368_v57 }
0x2c05   :  { %v1393_v7 = vrot.slane %v1388_v24, 4 }
0x2c06   :  { %v1402_v11 = vpop.permute.xlu0 %1401 }
0x2c07   :  { %v1404_v3 = vsel %vm709_vm5, %v1390_v16, %v1393_v7 }
0x2c08   :  { %v1405_v2 = vsel %vm711_vm6, %v1404_v3, %v1398_v9 }
0x2c09   :  { %v1406_v13 = vsel %vm713_vm7, %v1405_v2, %v1402_v11 }
0x2c0a   :  { %1408 = vrot.lane.b32.xlu1 %v1406_v13, %s1829_s9 }
0x2c7c   :  { %v1409_v6 = vpop.permute.xlu1 %1408 }
0x2c7d   :  { %v1411_v14 = vsel %vm68_vm1, %v1409_v6, 0.0 }
0x2c7e   :  { %1412 = vadd.xlane.f32.xlu0 %v1411_v14 }
0x2c94   :  { %1434 = vrot.lane.b32.xlu0 %v1517_v15, %s1830_s19 }
0x2d0b   :  { %v1413_v12 = vpop.xlane.xlu0 %1412 }
0x2d0c   :  { %v1415_v5 = vmul.f32 0.03125, %v1413_v12 }
0x2d0e   :  { %v1416_v4 = vsub.f32 %v1406_v13, %v1415_v5 }
0x2d0f   :  { %v1435_v26 = vpop.permute.xlu0 %1434 }
0x2d10   :  { %v1417_v17 = vmul.f32 %v1416_v4, %v1416_v4 }
0x2d12   :  { %1419 = vrot.lane.b32.xlu1 %v1417_v17, %s1829_s9 }
0x2d84   :  { %v1420_v1 = vpop.permute.xlu1 %1419 }
0x2d85   :  { %v1422_v8 = vsel %vm68_vm1, %v1420_v1, 0.0 }
0x2d86   :  { %1423 = vadd.xlane.f32.xlu1 %v1422_v8 }
0x2d97   :  { %1443 = vrot.lane.b32.xlu1 %v1518_v43, %s1830_s19 }
0x2e13   :  { %v1424_v18 = vpop.xlane.xlu1 %1423 }
0x2e14   :  { %v1425_v20 = vmul.f32 0.03125, %v1424_v18 }
0x2e16   :  { %v1426_v21 = vadd.f32 1e-05, %v1425_v20 }
0x2e17   :  { %v1444_v28 = vpop.permute.xlu1 %1443 }
0x2e18   :  { %1798 = vrsqrt.f32 %v1426_v21 }
0x2e22   :  { %v1799_v23 = vpop.eup %1798 }
0x2e23   :  { %v1428_v27 = vmul.f32 %v1799_v23, %v1416_v4 }
0x2e25   :  { %v1437_v29 = vmul.f32 %v1435_v26, %v1428_v27 }
0x2e27   :  { %v1446_v30 = vadd.f32 %v1444_v28, %v1437_v29 }
0x2e29   :  { %1448 = vrot.lane.b32.xlu0 %v1446_v30, %s1829_s9  ;;  %v1455_v31 = vrot.slane %v1446_v30, 4  ;;  %v1451_v32 = vrot.slane %v1446_v30, 2  ;;  %v1459_v37 = vrot.slane %v1446_v30, 6 }
0x2e2b   :  { %1456 = vrot.lane.b32.xlu1 %v1455_v31, %s1830_s19 }
0x2e2d   :  { %1452 = vrot.lane.b32.xlu0 %v1451_v32, %s1828_s8 }
0x2e9b   :  { %v1449_v33 = vpop.permute.xlu0 %1448 }
0x2e9d   :  { %v1457_v35 = vpop.permute.xlu1 %1456 }
0x2e9f   :  { %v1453_v34 = vpop.permute.xlu0 %1452 }
0x2ea0   :  { %v1461_v36 = vsel %vm68_vm1, %v1449_v33, %v1453_v34 }
0x2ea1   :  { %v1463_v38 = vsel %vm1462_vm8, %v1461_v36, %v1457_v35 }
0x2ea2   :  { %v1465_v39 = vsel %vm1464_vm9, %v1463_v38, %v1459_v37 }
0x2ea3   :  { %1466 = vst [vmem:[#allocation2] sm:$0x3] %v1465_v39 }
0x2ea4   :  { %1811 = shalt.err (!%p1808_p4)
}
0x2ea5   :  { %s1812_s25 = scalar_lea.hbm %s2216_s6, 32 }
0x2ea6   :  { %p1813_p5 = scmp.ne.s32.totalorder %s2216_s6, %s1812_s25  ;;  %p1816_p6 = scmp.lt.u32.totalorder %s1812_s25, %s2216_s6 }
0x2ea8   :  { %p1818_p7 = pnand %p1816_p6, %p1813_p5 }
0x2eaa   :  { %1821 = shalt.err (!%p1818_p7)
}
0x2eab   :  { %1476 = dma.vmem_to_hbm [thread:$0]  %s1474_s5, 32, %s2216_s6, [#allocation3]  }
0x2eac   :  { %1822 = dma.done.wait [#allocation3], 32  }
0x2ead   :  { %1823 = vsyncadd [#allocation3], 4294967264 }
0x2eae   :  { %1480 = vsyncpa [#allocation3], 1 }

</bundles_post_ra>
